<compile_context>
chip_gen: v7x
topology: tpu7x:2x2x1
jax: 0.10.0
libtpu: 0.0.40
codegen_flags: <defaults>
</compile_context>

<pallas_src>
import jax
import jax.numpy as jnp
from jax.experimental import pallas as pl
from jax.experimental.pallas import tpu as pltpu

EPS = 1e-5
KH = KW = 3
LANE = 128


def _round_up(x, m):
    return (x + m - 1) // m * m


def _co_chunk(cout_p):
    # 256-lane output chunks when possible (fills the 256-wide MXU on v6e/v7x),
    # otherwise 128.
    return 256 if cout_p % 256 == 0 else 128


def _vmem_limit_bytes():
    # v5e/v6e: 128 MiB VMEM per TensorCore; v7x: 64 MiB.  Leave headroom.
    try:
        cap = pltpu.get_tpu_info().vmem_capacity_bytes
    except Exception:
        cap = 64 * 1024 * 1024
    return int(min(cap * 3 // 4, 100 * 1024 * 1024))


def _pick_h_tile(H, w2p, co_chunk, budget_bytes=128 * 1024):
    # Keep the live f32 conv accumulator (h_tile*W2p rows x co_chunk lanes)
    # within ~32 vregs (vreg file = 64 x 4 KiB on v5e/v6e/v7x) so it never
    # spills across the three matmul taps.
    # TODO(synk): for prime H or very large W this degenerates to h_tile=1;
    # add W tiling / non-divisor edge tiles for production shapes.
    best = 1
    for t in range(1, H + 1):
        if H % t == 0 and t * w2p * co_chunk * 4 <= budget_bytes:
            best = t
    return best


# ---------------------------------------------------------------------------
# Phase 1: 3x3 conv (im2col over dx -> 3 MXU matmuls / Cout chunk) + partial
#          BN statistics.  Halo rows DMA'd straight from HBM, double-buffered.
# ---------------------------------------------------------------------------
def _conv_stats_kernel(x_hbm, w_hbm, y_ref, p_ref, x_buf, w_buf, sems):
    # x_hbm : (N, H+2, W2p, Cin_p)  bf16, HBM (pl.ANY)
    # w_hbm : (3, 3*Cin_p, Cout_p)  bf16, HBM (pl.ANY)
    # y_ref : (h_tile, W, Cout_p)   bf16 conv output tile (intermediate)
    # p_ref : (2, Cout_p)           f32 [sum, sum_of_squares] over the tile
    # x_buf : (2, h_tile+2, W2p, Cin_p) bf16 double buffer
    # w_buf : (3, 3*Cin_p, Cout_p)  bf16 staged weights
    # sems  : DMA semaphores (3,): [0],[1] = x slots, [2] = weights
    n = pl.program_id(0)
    j = pl.program_id(1)
    n_h = pl.num_programs(1)

    h_tile, W, cout_p = y_ref.shape
    w2p = x_buf.shape[2]
    cin_p = x_buf.shape[3]
    cc = _co_chunk(cout_p)
    M = h_tile * w2p
    slot = j % 2

    def x_copy(jj, s):
        return pltpu.make_async_copy(
            x_hbm.at[n, pl.ds(jj * h_tile, h_tile + 2)], x_buf.at[s], sems.at[s])

    def w_copy():
        return pltpu.make_async_copy(w_hbm, w_buf, sems.at[2])

    # j carries the double-buffer / staged-weight state -> the H-tile axis is
    # "arbitrary"; only the batch axis is "parallel" (megacore-safe).
    @pl.when(j == 0)
    def _():
        w_copy().start()            # stage weights once per image
        x_copy(j, slot).start()     # first tile of this image

    @pl.when(j + 1 < n_h)
    def _():
        x_copy(j + 1, 1 - slot).start()   # prefetch next H-tile (overlaps compute)

    x_copy(j, slot).wait()

    @pl.when(j == 0)
    def _():
        w_copy().wait()

    xb = x_buf[slot]                       # (h_tile+2, W2p, Cin_p) bf16

    # im2col over dx: one (M, 3*Cin_p) patch per dy.  The dx shift is a pure
    # row shift of the contiguous flatten; the wrapped tail only feeds columns
    # >= W, which are sliced away below (never part of a valid output).
    patches = []
    for dy in range(KH):
        flat = xb[dy:dy + h_tile].reshape(M, cin_p)
        parts = [flat]
        for dx in range(1, KW):
            parts.append(jnp.concatenate([flat[dx:], flat[:dx]], axis=0))
        patches.append(jnp.concatenate(parts, axis=-1))      # (M, 3*Cin_p)

    for co in range(cout_p // cc):
        lo, hi = co * cc, (co + 1) * cc
        acc = None
        for dy in range(KH):                                  # 3 matmuls, K=3*Cin_p
            d = jnp.dot(patches[dy], w_buf[dy, :, lo:hi],
                        preferred_element_type=jnp.float32)
            acc = d if acc is None else acc + d               # init from first tap
        valid = acc.reshape(h_tile, w2p, cc)[:, :W, :]        # drop pad/garbage cols
        # Conv bias intentionally omitted: a per-channel constant cancels exactly
        # under training-mode BatchNorm (batch-mean subtraction).
        y_ref[:, :, lo:hi] = valid.astype(y_ref.dtype)        # bf16 intermediate
        v2 = valid.reshape(h_tile * W, cc)                    # stats from f32 acc
        p_ref[:, lo:hi] = jnp.concatenate(                    # single (2, cc) store
            [jnp.sum(v2, axis=0, keepdims=True),
             jnp.sum(v2 * v2, axis=0, keepdims=True)], axis=0)


# ---------------------------------------------------------------------------
# Phase 2: pure epilogue y*scale + shift -> ReLU (scale/shift precomputed).
# ---------------------------------------------------------------------------
def _bn_relu_kernel(y_ref, scale_ref, shift_ref, o_ref):
    # y_ref : (h_tile, W, Cout_p) bf16 ; scale/shift : (1, 1, Cout_p) f32
    o_ref[...] = jnp.maximum(
        y_ref[...].astype(jnp.float32) * scale_ref[...] + shift_ref[...], 0.0)


def conv_block_forward(x_nchw, weight_oihw, bias, gamma, beta, h_tile=None):
    """Conv2d(3x3,s=1,p=1) -> BatchNorm2d (training-mode stats) -> ReLU.

    x_nchw: (N, Cin, H, W); weight_oihw: (Cout, Cin, 3, 3). `bias` is accepted
    for API parity but is mathematically irrelevant under training-mode BN.
    """
    del bias  # cancels exactly under the batch-mean subtraction
    N, Cin, H, W = x_nchw.shape
    Cout = weight_oihw.shape[0]
    cin_p = _round_up(Cin, LANE)
    cout_p = _round_up(Cout, LANE)
    cc = _co_chunk(cout_p)
    w2p = _round_up(W + 2, 16)          # conv pad + sublane-friendly width (bf16)

    if h_tile is None:
        h_tile = _pick_h_tile(H, w2p, cc)
    if H % h_tile != 0:
        raise ValueError(f"h_tile={h_tile} must divide H={H}")
    n_h = H // h_tile

    # ---- wrapper glue (XLA): layout, pad, channel pad.  NO halo duplication ----
    x = jnp.transpose(x_nchw, (0, 2, 3, 1))                         # NHWC
    x = jnp.pad(x, ((0, 0), (1, 1), (1, w2p - W - 1), (0, cin_p - Cin)))
    x = x.astype(jnp.bfloat16)                                      # (N, H+2, W2p, Cin_p)

    w = jnp.transpose(weight_oihw, (2, 3, 1, 0))                    # HWIO
    w = jnp.pad(w, ((0, 0), (0, 0), (0, cin_p - Cin), (0, cout_p - Cout)))
    w = w.astype(jnp.bfloat16).reshape(KH, KW * cin_p, cout_p)      # dx folded into K

    vmem_limit = _vmem_limit_bytes()
    grid = (N, n_h)

    # ---- phase 1: conv + per-tile partial statistics ----
    y_tiles, partials = pl.pallas_call(
        _conv_stats_kernel,
        grid=grid,
        in_specs=[
            pl.BlockSpec(memory_space=pl.ANY),   # padded activations stay in HBM
            pl.BlockSpec(memory_space=pl.ANY),   # weights staged manually (1 copy/image)
        ],
        out_specs=(
            pl.BlockSpec((None, None, h_tile, W, cout_p),
                         lambda n, j: (n, j, 0, 0, 0)),
            pl.BlockSpec((None, None, 2, cout_p),
                         lambda n, j: (n, j, 0, 0)),
        ),
        out_shape=(
            jax.ShapeDtypeStruct((N, n_h, h_tile, W, cout_p), jnp.bfloat16),
            jax.ShapeDtypeStruct((N, n_h, 2, cout_p), jnp.float32),
        ),
        scratch_shapes=[
            pltpu.VMEM((2, h_tile + 2, w2p, cin_p), jnp.bfloat16),  # x double buffer
            pltpu.VMEM((KH, KW * cin_p, cout_p), jnp.bfloat16),     # staged weights
            pltpu.SemaphoreType.DMA((3,)),
        ],
        compiler_params=pltpu.CompilerParams(
            dimension_semantics=("parallel", "arbitrary"),
            vmem_limit_bytes=vmem_limit),
    )(x, w)

    # ---- tiny global reduction (XLA): fold BN into per-channel scale/shift ----
    count = float(N * H * W)
    psum = jnp.sum(partials, axis=(0, 1))                 # (2, Cout_p)
    mean = psum[0] / count
    # TODO(synk): single-pass E[y^2]-mean^2 in f32 can cancel catastrophically at
    # large N*H*W; switch to a shifted / Welford-style combine at real sizes.
    var = psum[1] / count - mean * mean                   # biased, like PyTorch BN
    g = jnp.pad(gamma.astype(jnp.float32), (0, cout_p - Cout))
    b = jnp.pad(beta.astype(jnp.float32), (0, cout_p - Cout))
    scale_c = g * jax.lax.rsqrt(var + EPS)
    shift_c = b - mean * scale_c
    scale = scale_c.reshape(1, 1, cout_p)
    shift = shift_c.reshape(1, 1, cout_p)

    # ---- phase 2: folded affine + ReLU epilogue (lane-dense stores) ----
    out_tiles = pl.pallas_call(
        _bn_relu_kernel,
        grid=grid,
        in_specs=[
            pl.BlockSpec((None, None, h_tile, W, cout_p),
                         lambda n, j: (n, j, 0, 0, 0)),
            pl.BlockSpec((1, 1, cout_p), lambda n, j: (0, 0, 0)),
            pl.BlockSpec((1, 1, cout_p), lambda n, j: (0, 0, 0)),
        ],
        out_specs=pl.BlockSpec((None, None, h_tile, W, cout_p),
                               lambda n, j: (n, j, 0, 0, 0)),
        out_shape=jax.ShapeDtypeStruct((N, n_h, h_tile, W, cout_p), jnp.float32),
        compiler_params=pltpu.CompilerParams(
            dimension_semantics=("parallel", "parallel"),
            vmem_limit_bytes=vmem_limit),
    )(y_tiles, scale, shift)

    # ---- back to NCHW, drop channel padding ----
    # TODO(synk): if the consumer accepts NHWC, skip this transpose (saves a
    # full-tensor HBM pass; most valuable on v5e).
    out = out_tiles.reshape(N, H, W, cout_p)[:, :, :, :Cout]
    return jnp.transpose(out, (0, 3, 1, 2))


def reference_forward(x, weight, bias, gamma, beta):
    """Plain-JAX f32 reference matching the PyTorch module (training-mode BN)."""
    y = jax.lax.conv_general_dilated(
        x.astype(jnp.float32), weight.astype(jnp.float32),
        window_strides=(1, 1), padding=((1, 1), (1, 1)),
        dimension_numbers=("NCHW", "OIHW", "NCHW"))
    y = y + bias[None, :, None, None]
    mean = jnp.mean(y, axis=(0, 2, 3), keepdims=True)
    var = jnp.mean((y - mean) ** 2, axis=(0, 2, 3), keepdims=True)
    y = (y - mean) / jnp.sqrt(var + EPS)
    y = y * gamma[None, :, None, None] + beta[None, :, None, None]
    return jnp.maximum(y, 0.0)


if __name__ == "__main__":
    N, Cin, Cout, H, W = 2, 4, 8, 16, 16

    key = jax.random.PRNGKey(0)
    kx, kw, kb, kg, kbe = jax.random.split(key, 5)

    x = jax.random.normal(kx, (N, Cin, H, W), dtype=jnp.float32)
    weight = jax.random.normal(kw, (Cout, Cin, KH, KW), dtype=jnp.float32) * 0.1
    bias = jax.random.normal(kb, (Cout,), dtype=jnp.float32) * 0.1
    gamma = 1.0 + 0.1 * jax.random.normal(kg, (Cout,), dtype=jnp.float32)
    beta = 0.1 * jax.random.normal(kbe, (Cout,), dtype=jnp.float32)

    # Auto h_tile=8 at these shapes -> grid (N=2, nH=2): exercises the manual
    # halo DMA double-buffer path and the tiled grid.
    out = conv_block_forward(x, weight, bias, gamma, beta)
    out = jax.block_until_ready(out)

    ref = reference_forward(x, weight, bias, gamma, beta)
    assert out.shape == (N, Cout, H, W), out.shape
    max_err = float(jnp.max(jnp.abs(out - ref)))
    # bf16 MXU operands + bf16 intermediate -> compare at bf16-level tolerance.
    assert jnp.allclose(out, ref, rtol=5e-2, atol=5e-2), max_err

    print("KERNEL_OK")
</pallas_src>

<mosaic_0001>
module attributes {stable_mosaic.version = 11 : i64} {
  func.func @_conv_stats_kernel(%arg0: i32, %arg1: i32, %arg2: memref<2x18x32x128xbf16, #tpu.memory_space<any>>, %arg3: memref<3x384x128xbf16, #tpu.memory_space<any>>, %arg4: memref<1x1x8x16x128xbf16, #tpu.memory_space<vmem>>, %arg5: memref<1x1x2x128xf32, #tpu.memory_space<vmem>>, %arg6: memref<2x10x32x128xbf16, #tpu.memory_space<vmem>>, %arg7: memref<3x384x128xbf16, #tpu.memory_space<vmem>>, %arg8: memref<3x!tpu.dma_semaphore, #tpu.memory_space<semaphore_mem>>) attributes {dimension_semantics = [#tpu.dimension_semantics<parallel>, #tpu.dimension_semantics<arbitrary>], iteration_bounds = array<i64: 2, 2>, scalar_prefetch = 0 : i64, scratch_operands = 3 : i64, tpu.core_type = #tpu.core_type<tc>, window_params = [{}, {}, {transform_indices = @transform_2, window_bounds = array<i64: 1, 1, 8, 16, 128>}, {transform_indices = @transform_3, window_bounds = array<i64: 1, 1, 2, 128>}]} {
    %c2_i32 = arith.constant 2 : i32
    %c0_i32 = arith.constant 0 : i32
    %0 = arith.cmpi eq, %c2_i32, %c0_i32 : i32
    %c1_i32 = arith.constant 1 : i32
    %1 = arith.select %0, %c1_i32, %c2_i32 : i32
    %2 = arith.remsi %arg1, %1 : i32
    %c0_i32_0 = arith.constant 0 : i32
    %3 = arith.cmpi ne, %2, %c0_i32_0 : i32
    %c0_i32_1 = arith.constant 0 : i32
    %4 = arith.cmpi slt, %2, %c0_i32_1 : i32
    %c0_i32_2 = arith.constant 0 : i32
    %5 = arith.cmpi slt, %1, %c0_i32_2 : i32
    %6 = arith.xori %4, %5 : i1
    %7 = arith.andi %6, %3 : i1
    %8 = arith.addi %2, %1 : i32
    %9 = arith.select %7, %8, %2 : i32
    %c0_i32_3 = arith.constant 0 : i32
    %10 = arith.cmpi eq, %arg1, %c0_i32_3 : i32
    %11 = arith.extui %10 : i1 to i32
    %c0_i32_4 = arith.constant 0 : i32
    %12 = arith.cmpi ne, %11, %c0_i32_4 : i32
    scf.if %12 {
      %c2_i32_37 = arith.constant 2 : i32
      %84 = tpu.memref_slice %arg8[%c2_i32_37] : memref<3x!tpu.dma_semaphore, #tpu.memory_space<semaphore_mem>> -> memref<1x!tpu.dma_semaphore, #tpu.memory_space<semaphore_mem>>
      %85 = tpu.memref_squeeze %84 : memref<1x!tpu.dma_semaphore, #tpu.memory_space<semaphore_mem>> -> memref<!tpu.dma_semaphore, #tpu.memory_space<semaphore_mem>>
      tpu.enqueue_dma source(%arg3 : memref<3x384x128xbf16, #tpu.memory_space<any>>) target(%arg7 : memref<3x384x128xbf16, #tpu.memory_space<vmem>>) target_semaphore(%85 : memref<!tpu.dma_semaphore, #tpu.memory_space<semaphore_mem>>)
      %c8_i32_38 = arith.constant 8 : i32
      %86 = arith.muli %arg1, %c8_i32_38 : i32
      %c0_i32_39 = arith.constant 0 : i32
      %c0_i32_40 = arith.constant 0 : i32
      %87 = tpu.memref_slice %arg2[%arg0, %86, %c0_i32_39, %c0_i32_40] : memref<2x18x32x128xbf16, #tpu.memory_space<any>> -> memref<1x10x32x128xbf16, #tpu.memory_space<any>>
      %88 = tpu.memref_squeeze %87 : memref<1x10x32x128xbf16, #tpu.memory_space<any>> -> memref<10x32x128xbf16, #tpu.memory_space<any>>
      %c0_i32_41 = arith.constant 0 : i32
      %c0_i32_42 = arith.constant 0 : i32
      %c0_i32_43 = arith.constant 0 : i32
      %89 = tpu.memref_slice %arg6[%9, %c0_i32_41, %c0_i32_42, %c0_i32_43] : memref<2x10x32x128xbf16, #tpu.memory_space<vmem>> -> memref<1x10x32x128xbf16, #tpu.memory_space<vmem>>
      %90 = tpu.memref_squeeze %89 : memref<1x10x32x128xbf16, #tpu.memory_space<vmem>> -> memref<10x32x128xbf16, #tpu.memory_space<vmem>>
      %91 = tpu.memref_slice %arg8[%9] : memref<3x!tpu.dma_semaphore, #tpu.memory_space<semaphore_mem>> -> memref<1x!tpu.dma_semaphore, #tpu.memory_space<semaphore_mem>>
      %92 = tpu.memref_squeeze %91 : memref<1x!tpu.dma_semaphore, #tpu.memory_space<semaphore_mem>> -> memref<!tpu.dma_semaphore, #tpu.memory_space<semaphore_mem>>
      tpu.enqueue_dma source(%88 : memref<10x32x128xbf16, #tpu.memory_space<any>>) target(%90 : memref<10x32x128xbf16, #tpu.memory_space<vmem>>) target_semaphore(%92 : memref<!tpu.dma_semaphore, #tpu.memory_space<semaphore_mem>>)
    } else {
    }
    %c1_i32_5 = arith.constant 1 : i32
    %13 = arith.addi %arg1, %c1_i32_5 : i32
    %c2_i32_6 = arith.constant 2 : i32
    %14 = arith.cmpi slt, %13, %c2_i32_6 : i32
    %15 = arith.extui %14 : i1 to i32
    %c0_i32_7 = arith.constant 0 : i32
    %16 = arith.cmpi ne, %15, %c0_i32_7 : i32
    scf.if %16 {
      %c1_i32_37 = arith.constant 1 : i32
      %84 = arith.addi %arg1, %c1_i32_37 : i32
      %c1_i32_38 = arith.constant 1 : i32
      %85 = arith.subi %c1_i32_38, %9 : i32
      %c8_i32_39 = arith.constant 8 : i32
      %86 = arith.muli %84, %c8_i32_39 : i32
      %c0_i32_40 = arith.constant 0 : i32
      %c0_i32_41 = arith.constant 0 : i32
      %87 = tpu.memref_slice %arg2[%arg0, %86, %c0_i32_40, %c0_i32_41] : memref<2x18x32x128xbf16, #tpu.memory_space<any>> -> memref<1x10x32x128xbf16, #tpu.memory_space<any>>
      %88 = tpu.memref_squeeze %87 : memref<1x10x32x128xbf16, #tpu.memory_space<any>> -> memref<10x32x128xbf16, #tpu.memory_space<any>>
      %c0_i32_42 = arith.constant 0 : i32
      %c0_i32_43 = arith.constant 0 : i32
      %c0_i32_44 = arith.constant 0 : i32
      %89 = tpu.memref_slice %arg6[%85, %c0_i32_42, %c0_i32_43, %c0_i32_44] : memref<2x10x32x128xbf16, #tpu.memory_space<vmem>> -> memref<1x10x32x128xbf16, #tpu.memory_space<vmem>>
      %90 = tpu.memref_squeeze %89 : memref<1x10x32x128xbf16, #tpu.memory_space<vmem>> -> memref<10x32x128xbf16, #tpu.memory_space<vmem>>
      %91 = tpu.memref_slice %arg8[%85] : memref<3x!tpu.dma_semaphore, #tpu.memory_space<semaphore_mem>> -> memref<1x!tpu.dma_semaphore, #tpu.memory_space<semaphore_mem>>
      %92 = tpu.memref_squeeze %91 : memref<1x!tpu.dma_semaphore, #tpu.memory_space<semaphore_mem>> -> memref<!tpu.dma_semaphore, #tpu.memory_space<semaphore_mem>>
      tpu.enqueue_dma source(%88 : memref<10x32x128xbf16, #tpu.memory_space<any>>) target(%90 : memref<10x32x128xbf16, #tpu.memory_space<vmem>>) target_semaphore(%92 : memref<!tpu.dma_semaphore, #tpu.memory_space<semaphore_mem>>)
    } else {
    }
    %c8_i32 = arith.constant 8 : i32
    %17 = arith.muli %arg1, %c8_i32 : i32
    %c0_i32_8 = arith.constant 0 : i32
    %c0_i32_9 = arith.constant 0 : i32
    %18 = tpu.memref_slice %arg2[%arg0, %17, %c0_i32_8, %c0_i32_9] : memref<2x18x32x128xbf16, #tpu.memory_space<any>> -> memref<1x10x32x128xbf16, #tpu.memory_space<any>>
    %19 = tpu.memref_squeeze %18 : memref<1x10x32x128xbf16, #tpu.memory_space<any>> -> memref<10x32x128xbf16, #tpu.memory_space<any>>
    %c0_i32_10 = arith.constant 0 : i32
    %c0_i32_11 = arith.constant 0 : i32
    %c0_i32_12 = arith.constant 0 : i32
    %20 = tpu.memref_slice %arg6[%9, %c0_i32_10, %c0_i32_11, %c0_i32_12] : memref<2x10x32x128xbf16, #tpu.memory_space<vmem>> -> memref<1x10x32x128xbf16, #tpu.memory_space<vmem>>
    %21 = tpu.memref_squeeze %20 : memref<1x10x32x128xbf16, #tpu.memory_space<vmem>> -> memref<10x32x128xbf16, #tpu.memory_space<vmem>>
    %22 = tpu.memref_slice %arg8[%9] : memref<3x!tpu.dma_semaphore, #tpu.memory_space<semaphore_mem>> -> memref<1x!tpu.dma_semaphore, #tpu.memory_space<semaphore_mem>>
    %23 = tpu.memref_squeeze %22 : memref<1x!tpu.dma_semaphore, #tpu.memory_space<semaphore_mem>> -> memref<!tpu.dma_semaphore, #tpu.memory_space<semaphore_mem>>
    tpu.wait_dma2 semaphore(%23 : memref<!tpu.dma_semaphore, #tpu.memory_space<semaphore_mem>>) src(%19 : memref<10x32x128xbf16, #tpu.memory_space<any>>) dst(%21 : memref<10x32x128xbf16, #tpu.memory_space<vmem>>)
    %c0_i32_13 = arith.constant 0 : i32
    %24 = arith.cmpi eq, %arg1, %c0_i32_13 : i32
    %25 = arith.extui %24 : i1 to i32
    %c0_i32_14 = arith.constant 0 : i32
    %26 = arith.cmpi ne, %25, %c0_i32_14 : i32
    scf.if %26 {
      %c2_i32_37 = arith.constant 2 : i32
      %84 = tpu.memref_slice %arg8[%c2_i32_37] : memref<3x!tpu.dma_semaphore, #tpu.memory_space<semaphore_mem>> -> memref<1x!tpu.dma_semaphore, #tpu.memory_space<semaphore_mem>>
      %85 = tpu.memref_squeeze %84 : memref<1x!tpu.dma_semaphore, #tpu.memory_space<semaphore_mem>> -> memref<!tpu.dma_semaphore, #tpu.memory_space<semaphore_mem>>
      tpu.wait_dma2 semaphore(%85 : memref<!tpu.dma_semaphore, #tpu.memory_space<semaphore_mem>>) src(%arg3 : memref<3x384x128xbf16, #tpu.memory_space<any>>) dst(%arg7 : memref<3x384x128xbf16, #tpu.memory_space<vmem>>)
    } else {
    }
    %27 = arith.index_cast %9 : i32 to index
    %c0 = arith.constant 0 : index
    %c0_15 = arith.constant 0 : index
    %c0_16 = arith.constant 0 : index
    %28 = vector.load %arg6[%27, %c0, %c0_15, %c0_16] : memref<2x10x32x128xbf16, #tpu.memory_space<vmem>>, vector<1x10x32x128xbf16>
    %29 = vector.shape_cast %28 : vector<1x10x32x128xbf16> to vector<10x32x128xbf16>
    %30 = vector.extract_strided_slice %29 {offsets = [0, 0, 0], sizes = [8, 32, 128], strides = [1, 1, 1]} : vector<10x32x128xbf16> to vector<8x32x128xbf16>
    %31 = vector.shape_cast %30 : vector<8x32x128xbf16> to vector<256x128xbf16>
    %32 = vector.extract_strided_slice %31 {offsets = [1, 0], sizes = [255, 128], strides = [1, 1]} : vector<256x128xbf16> to vector<255x128xbf16>
    %33 = vector.extract_strided_slice %31 {offsets = [0, 0], sizes = [1, 128], strides = [1, 1]} : vector<256x128xbf16> to vector<1x128xbf16>
    %34 = tpu.concatenate %32, %33 in 0 : vector<255x128xbf16>, vector<1x128xbf16> -> vector<256x128xbf16>
    %35 = vector.extract_strided_slice %31 {offsets = [2, 0], sizes = [254, 128], strides = [1, 1]} : vector<256x128xbf16> to vector<254x128xbf16>
    %36 = vector.extract_strided_slice %31 {offsets = [0, 0], sizes = [2, 128], strides = [1, 1]} : vector<256x128xbf16> to vector<2x128xbf16>
    %37 = tpu.concatenate %35, %36 in 0 : vector<254x128xbf16>, vector<2x128xbf16> -> vector<256x128xbf16>
    %38 = tpu.concatenate %31, %34, %37 in 1 : vector<256x128xbf16>, vector<256x128xbf16>, vector<256x128xbf16> -> vector<256x384xbf16>
    %39 = vector.extract_strided_slice %29 {offsets = [1, 0, 0], sizes = [8, 32, 128], strides = [1, 1, 1]} : vector<10x32x128xbf16> to vector<8x32x128xbf16>
    %40 = vector.shape_cast %39 : vector<8x32x128xbf16> to vector<256x128xbf16>
    %41 = vector.extract_strided_slice %40 {offsets = [1, 0], sizes = [255, 128], strides = [1, 1]} : vector<256x128xbf16> to vector<255x128xbf16>
    %42 = vector.extract_strided_slice %40 {offsets = [0, 0], sizes = [1, 128], strides = [1, 1]} : vector<256x128xbf16> to vector<1x128xbf16>
    %43 = tpu.concatenate %41, %42 in 0 : vector<255x128xbf16>, vector<1x128xbf16> -> vector<256x128xbf16>
    %44 = vector.extract_strided_slice %40 {offsets = [2, 0], sizes = [254, 128], strides = [1, 1]} : vector<256x128xbf16> to vector<254x128xbf16>
    %45 = vector.extract_strided_slice %40 {offsets = [0, 0], sizes = [2, 128], strides = [1, 1]} : vector<256x128xbf16> to vector<2x128xbf16>
    %46 = tpu.concatenate %44, %45 in 0 : vector<254x128xbf16>, vector<2x128xbf16> -> vector<256x128xbf16>
    %47 = tpu.concatenate %40, %43, %46 in 1 : vector<256x128xbf16>, vector<256x128xbf16>, vector<256x128xbf16> -> vector<256x384xbf16>
    %48 = vector.extract_strided_slice %29 {offsets = [2, 0, 0], sizes = [8, 32, 128], strides = [1, 1, 1]} : vector<10x32x128xbf16> to vector<8x32x128xbf16>
    %49 = vector.shape_cast %48 : vector<8x32x128xbf16> to vector<256x128xbf16>
    %50 = vector.extract_strided_slice %49 {offsets = [1, 0], sizes = [255, 128], strides = [1, 1]} : vector<256x128xbf16> to vector<255x128xbf16>
    %51 = vector.extract_strided_slice %49 {offsets = [0, 0], sizes = [1, 128], strides = [1, 1]} : vector<256x128xbf16> to vector<1x128xbf16>
    %52 = tpu.concatenate %50, %51 in 0 : vector<255x128xbf16>, vector<1x128xbf16> -> vector<256x128xbf16>
    %53 = vector.extract_strided_slice %49 {offsets = [2, 0], sizes = [254, 128], strides = [1, 1]} : vector<256x128xbf16> to vector<254x128xbf16>
    %54 = vector.extract_strided_slice %49 {offsets = [0, 0], sizes = [2, 128], strides = [1, 1]} : vector<256x128xbf16> to vector<2x128xbf16>
    %55 = tpu.concatenate %53, %54 in 0 : vector<254x128xbf16>, vector<2x128xbf16> -> vector<256x128xbf16>
    %56 = tpu.concatenate %49, %52, %55 in 1 : vector<256x128xbf16>, vector<256x128xbf16>, vector<256x128xbf16> -> vector<256x384xbf16>
    %c0_17 = arith.constant 0 : index
    %c0_18 = arith.constant 0 : index
    %c0_19 = arith.constant 0 : index
    %57 = vector.load %arg7[%c0_17, %c0_18, %c0_19] : memref<3x384x128xbf16, #tpu.memory_space<vmem>>, vector<1x384x128xbf16>
    %58 = vector.shape_cast %57 : vector<1x384x128xbf16> to vector<384x128xbf16>
    %cst = arith.constant dense<0.000000e+00> : vector<256x128xf32>
    %59 = tpu.matmul %38, %58, %cst {dimension_numbers = #tpu.dot_dimension_numbers<[1], [0], [0], [1], [0, 0, 1, 1], [], []>} : vector<256x384xbf16>, vector<384x128xbf16>, vector<256x128xf32> -> vector<256x128xf32>
    %c1 = arith.constant 1 : index
    %c0_20 = arith.constant 0 : index
    %c0_21 = arith.constant 0 : index
    %60 = vector.load %arg7[%c1, %c0_20, %c0_21] : memref<3x384x128xbf16, #tpu.memory_space<vmem>>, vector<1x384x128xbf16>
    %61 = vector.shape_cast %60 : vector<1x384x128xbf16> to vector<384x128xbf16>
    %cst_22 = arith.constant dense<0.000000e+00> : vector<256x128xf32>
    %62 = tpu.matmul %47, %61, %cst_22 {dimension_numbers = #tpu.dot_dimension_numbers<[1], [0], [0], [1], [0, 0, 1, 1], [], []>} : vector<256x384xbf16>, vector<384x128xbf16>, vector<256x128xf32> -> vector<256x128xf32>
    %63 = arith.addf %59, %62 : vector<256x128xf32>
    %c2 = arith.constant 2 : index
    %c0_23 = arith.constant 0 : index
    %c0_24 = arith.constant 0 : index
    %64 = vector.load %arg7[%c2, %c0_23, %c0_24] : memref<3x384x128xbf16, #tpu.memory_space<vmem>>, vector<1x384x128xbf16>
    %65 = vector.shape_cast %64 : vector<1x384x128xbf16> to vector<384x128xbf16>
    %cst_25 = arith.constant dense<0.000000e+00> : vector<256x128xf32>
    %66 = tpu.matmul %56, %65, %cst_25 {dimension_numbers = #tpu.dot_dimension_numbers<[1], [0], [0], [1], [0, 0, 1, 1], [], []>} : vector<256x384xbf16>, vector<384x128xbf16>, vector<256x128xf32> -> vector<256x128xf32>
    %67 = arith.addf %63, %66 : vector<256x128xf32>
    %68 = vector.shape_cast %67 : vector<256x128xf32> to vector<8x32x128xf32>
    %69 = vector.extract_strided_slice %68 {offsets = [0, 0, 0], sizes = [8, 16, 128], strides = [1, 1, 1]} : vector<8x32x128xf32> to vector<8x16x128xf32>
    %70 = arith.truncf %69 : vector<8x16x128xf32> to vector<8x16x128xbf16>
    %c0_26 = arith.constant 0 : index
    %c0_27 = arith.constant 0 : index
    %c0_28 = arith.constant 0 : index
    %c0_29 = arith.constant 0 : index
    %c0_30 = arith.constant 0 : index
    %71 = vector.load %arg4[%c0_26, %c0_27, %c0_28, %c0_29, %c0_30] : memref<1x1x8x16x128xbf16, #tpu.memory_space<vmem>>, vector<1x1x8x16x128xbf16>
    %72 = vector.shape_cast %71 : vector<1x1x8x16x128xbf16> to vector<8x16x128xbf16>
    %73 = vector.shape_cast %70 : vector<8x16x128xbf16> to vector<1x1x8x16x128xbf16>
    tpu.vector_store %arg4[%c0_26, %c0_27, %c0_28, %c0_29, %c0_30], %73 {strides = array<i32>} : memref<1x1x8x16x128xbf16, #tpu.memory_space<vmem>>, vector<1x1x8x16x128xbf16>,
    %74 = vector.shape_cast %69 : vector<8x16x128xf32> to vector<128x128xf32>
    %cst_31 = arith.constant dense<0.000000e+00> : vector<128xf32>
    %75 = vector.multi_reduction <add>, %74, %cst_31 [0] : vector<128x128xf32> to vector<128xf32>
    %76 = vector.shape_cast %75 : vector<128xf32> to vector<1x128xf32>
    %77 = arith.mulf %74, %74 : vector<128x128xf32>
    %cst_32 = arith.constant dense<0.000000e+00> : vector<128xf32>
    %78 = vector.multi_reduction <add>, %77, %cst_32 [0] : vector<128x128xf32> to vector<128xf32>
    %79 = vector.shape_cast %78 : vector<128xf32> to vector<1x128xf32>
    %80 = tpu.concatenate %76, %79 in 0 : vector<1x128xf32>, vector<1x128xf32> -> vector<2x128xf32>
    %c0_33 = arith.constant 0 : index
    %c0_34 = arith.constant 0 : index
    %c0_35 = arith.constant 0 : index
    %c0_36 = arith.constant 0 : index
    %81 = vector.load %arg5[%c0_33, %c0_34, %c0_35, %c0_36] : memref<1x1x2x128xf32, #tpu.memory_space<vmem>>, vector<1x1x2x128xf32>
    %82 = vector.shape_cast %81 : vector<1x1x2x128xf32> to vector<2x128xf32>
    %83 = vector.shape_cast %80 : vector<2x128xf32> to vector<1x1x2x128xf32>
    tpu.vector_store %arg5[%c0_33, %c0_34, %c0_35, %c0_36], %83 {strides = array<i32>} : memref<1x1x2x128xf32, #tpu.memory_space<vmem>>, vector<1x1x2x128xf32>,
    return
  }
  func.func @transform_2(%arg0: i32, %arg1: i32) -> (i32, i32, i32, i32, i32) {
    %c0_i32 = arith.constant 0 : i32
    %c0_i32_0 = arith.constant 0 : i32
    %c0_i32_1 = arith.constant 0 : i32
    %c0_i32_2 = arith.constant 0 : i32
    return %arg0, %arg1, %c0_i32, %c0_i32_0, %c0_i32_1 : i32, i32, i32, i32, i32
  }
  func.func @transform_3(%arg0: i32, %arg1: i32) -> (i32, i32, i32, i32) {
    %c0_i32 = arith.constant 0 : i32
    %c0_i32_0 = arith.constant 0 : i32
    %c0_i32_1 = arith.constant 0 : i32
    return %arg0, %arg1, %c0_i32, %c0_i32_0 : i32, i32, i32, i32
  }
}

</mosaic_0001>

<bundles_post_ra>
// kernel: tpu_custom_call.1
= control target key start
LH: loop header
LB: loop body
LE: loop exit
PB: predicated region body
PF: predicated region fallthrough
CT: control target
= control target key end

     0   :  { %s3645_s0 = inlined_call_operand.hbm [shape: bf16[2,18,32,128], index: 0, kind: input, shape index: {}]   ;;  %s3646_s1 = inlined_call_operand.hbm [shape: bf16[3,384,128], index: 1, kind: input, shape index: {}]   ;;  %s3647_s2 = inlined_call_operand.hbm [shape: bf16[2,2,8,16,128], index: 2, kind: output, shape index: {0}]   ;;  %s3648_s3 = inlined_call_operand.hbm [shape: f32[2,2,2,128], index: 3, kind: output, shape index: {1}]  }
   0x1   :  { %3655 = sst [smem:[#allocation24_spill]] %s3646_s1 }
   0x2   :  { %9 = vsyncpa [#allocation6], 0 }
   0x3   :  { %11 = vsyncpa [#allocation6 + $0x1], 0 }
   0x4   :  { %12 = vsyncpa [#allocation8], 0 }
   0x5   :  { %14 = vsyncpa [#allocation8 + $0x1], 0  ;;  %s2824_s12 = smov 0   ;;  %s2826_s13 = smov 0  }
   0x6   :  { %s2828_s14 = smov 0   ;;  %s2830_s15 = smov 0  }
   0x7   :  { %s2832_s16 = smov 0  }
   0x8 LB: > { %s2850_s17 = sadd.s32 1, %s2788_s14  ;;  %s29_s18 = sadd.s32 1, %s2792_s15  ;;  %s2796_s16 = sphi %s2832_s16, %s20_s16   ;;  %s2792_s15 = sphi %s2830_s15, %s3677_s15   ;;  %s2788_s14 = sphi %s2828_s14, %s3676_s14   ;;  %s2784_s13 = sphi %s2826_s13, %s3679_s13   ;;  %s2780_s12 = sphi %s2824_s12, %s3678_s12  }
   0x9   : > { %p27_p0 = scmp.ge.s32.totalorder %s2850_s17, 2  ;;  %s1753_s19 = sadd.s32 4294967295, %s2796_s16  }
   0xa   : > { %p47_p1 = scmp.ne.s32.totalorder %s2784_s13, %s2780_s12  ;;  %p48_p3 = scmp.eq.s32.totalorder %s1753_s19, 3 }
   0xb   : > { %s2856_s20 = scalar_select %p27_p0, 0, %s2850_s17  }
   0xc   : > { %s3681_s18 = smov (!%p27_p0, %s29_s18), %s2792_s15  ;;  %p2865_p4 = por %p48_p3, %p47_p1 }
   0xd   : > { %3656 = sst [smem:[#allocation21_spill]] %s2856_s20  ;;  %p31_p2 = scmp.ge.s32.totalorder %s3681_s18, 2 }
   0xe   : > { %s34_s21 = ssub.s32 %s2788_s14, %s2856_s20  ;;  %s38_s24 = sadd.s32 1, %s2784_s13 }
   0xf   : > { %s3683_s18 = smov (%p31_p2, %s3681_s18), 0  ;;  %p42_p5 = scmp.eq.s32.totalorder %s2796_s16, 3 }
  0x10   : > { %3657 = sst [smem:[#allocation22_spill]] %s3683_s18  ;;  %s33_s23 = ssub.s32 %s2792_s15, %s3683_s18 }
  0x11   : > { %s3658_s22 = scalar_select %p2865_p4, 1, 0 }
  0x12   : > { %s35_s25 = sor.u32 %s34_s21, %s33_s23  ;;  %p1756_p9 = scmp.ge.s32.totalorder %s2796_s16, 4 }
  0x13   : > { %p36_p6 = scmp.eq.s32.totalorder %s35_s25, 0  ;;  %p1754_p7 = scmp.ne.s32.totalorder %s35_s25, 0 }
  0x14   : > { %78 = sbr.rel (%p1756_p9) target bundleno = 689 (0x2b1), region = 12  ;;  %s2882_s28 = sand.u32 (!%p1756_p9), 1, %s2784_s13  }
  0x15   : > { %s2874_s26 = scalar_select %p36_p6, %s2784_s13, %s38_s24  }
  0x16   : > { %p2876_p8 = por %p1754_p7, %p42_p5  ;;  %p3653_p10 = scmp.eq.s32.totalorder (!%p1756_p9), %s2788_s14, 0 }
  0x17   : > { %3659 = sst [smem:[#allocation23_spill]] %s2874_s26  ;;  %s2798_s4 = smov (!%p1756_p9), [#allocation3]  }
  0x18   : > { %s3660_s27 = scalar_select %p2876_p8, 1, 0 }
  0x19   : > { %s118_s5 = sshll.u32 (!%p1756_p9), %s2798_s4, 4  ;;  %s95_s6 = ssub.s32 (!%p1756_p9), 0, %s2788_s14  ;;  %s119_s5 = int_to_ptr.vmem [resolvable:$true] %s118_s5 }
  0x1a   : > { %s3661_s1 = sld [smem:[#allocation24_spill]] (!%p1756_p9) }
  0x20   : > { %s2605_s9 = scalar_lea.hbm %s3661_s1, 9216 }
  0x21   : > { %p2606_p11 = scmp.ne.s32.totalorder %s3661_s1, %s2605_s9  ;;  %p2611_p0 = scmp.lt.u32.totalorder %s2605_s9, %s3661_s1 }
  0x23   : > { %p2607_p12 = pnand %p2606_p11, %p3653_p10 }
  0x25   : > { %p2608_p13 = pneg %p2607_p12 }
  0x27   : > { %p2613_p1 = pnand %p2611_p0, %p2608_p13 }
  0x29   : > { %2616 = shalt.err (!%p2613_p1)  }
  0x2a   : > { %s2617_s23 = scalar_lea.vmem %s119_s5, 9216  ;;  %p2624_p6 = scmp.lt.s32.totalorder %s119_s5, %s119_s5 }
  0x2b   : > { %p2618_p2 = scmp.ne.s32.totalorder %s119_s5, %s2617_s23  ;;  %p2625_p7 = scmp.lt.s32.totalorder %s2617_s23, %s2617_s23 }
  0x2d   : > { %p2619_p3 = pnand %p2618_p2, %p3653_p10  ;;  %p2626_p9 = por %p2625_p7, %p2624_p6 }
  0x2f   : > { %p2620_p5 = pneg %p2619_p3 }
  0x31   : > { %p2627_p4 = pnand %p2626_p9, %p2620_p5 }
  0x33   : > { %2630 = shalt.err (!%p2627_p4)  }
  0x34   : > { %2541 = dma.hbm_to_vmem [thread:$0]  (%p3653_p10), %s3661_s1, 9216, %s119_s5, [#allocation4 + $0x2] }
  0x35   : > { %s1759_s4 = smin.u32 %s2788_s14, %s95_s6  ;;  %s1801_s7 = sshll.u32 %s2788_s14, 5 }
  0x36   : > { %s97_s8 = sand.u32 1, %s1759_s4   ;;  %s124_s9 = smul.u32 72, %s2792_s15 }
  0x37   : > { %p1761_p11 = scmp.lt.s32.totalorder %s97_s8, 0  ;;  %s104_s11 = sadd.s32 2, %s97_s8 }
  0x38   : > { %s125_s10 = sadd.s32 %s1801_s7, %s124_s9  ;;  %s3650_s23 = scalar_lea.hbm %s3645_s0, 9216 }
  0x39   : > { %s1765_s19 = sshll.u32 %s125_s10, 6  ;;  %s3685_s11 = smov (!%p1761_p11, %s104_s11), %s97_s8 }
  0x3a   : > { %s2914_s24 = scalar_lea.hbm %s3645_s0, %s1765_s19  ;;  %s1802_s5 = smul.u32 160, %s3685_s11 }
  0x3b   : > { %s3649_s6 = ssub.s32 1, %s3685_s11  ;;  %s2920_s25 = scalar_lea.hbm %s2914_s24, 2048 }
  0x3c   : > { %s2924_s4 = smul.u32 160, %s3649_s6  ;;  %s2926_s7 = scalar_lea.vmem [#allocation2], %s1802_s5 }
  0x3d   : > { %s139_s8 = sshll.u32 %s2926_s7, 4  ;;  %s2930_s9 = scalar_lea.sflag [#allocation4], %s3685_s11  ;;  %s140_s8 = int_to_ptr.vmem [resolvable:$true] %s139_s8 }
  0x3e   : > { %s2631_s10 = scalar_lea.hbm %s2914_s24, 2560  ;;  %p2636_p1 = scmp.lt.u32.totalorder %s2914_s24, %s3645_s0 }
  0x3f   : > { %p2632_p12 = scmp.ne.s32.totalorder %s2914_s24, %s2631_s10  ;;  %p2637_p2 = scmp.lt.u32.totalorder %s3650_s23, %s2631_s10 }
  0x40   : > { %p2639_p5 = scmp.lt.u32.totalorder %s2631_s10, %s2914_s24 }
  0x41   : > { %p2633_p13 = pnand %p2632_p12, %p3653_p10  ;;  %p2638_p3 = por %p2637_p2, %p2636_p1 }
  0x43   : > { %p2634_p0 = pneg %p2633_p13  ;;  %p2640_p6 = por %p2639_p5, %p2638_p3 }
  0x45   : > { %p2641_p7 = pnand %p2640_p6, %p2634_p0 }
  0x47   : > { %2644 = shalt.err (!%p2641_p7)  }
  0x48   : > { %s2645_s1 = scalar_lea.vmem %s140_s8, 2560  ;;  %s2799_s19 = smov [#allocation2]  }
  0x49   : > { %p2646_p9 = scmp.ne.s32.totalorder %s140_s8, %s2645_s1  ;;  %s2649_s21 = sshll.u32 %s2799_s19, 4  ;;  %s2950_s21 = int_to_ptr.vmem [resolvable:$false] %s2649_s21 }
  0x4a   : > { %s2651_s29 = scalar_lea.vmem %s2950_s21, 5120  ;;  %p2652_p13 = scmp.lt.s32.totalorder %s140_s8, %s2950_s21 }
  0x4b   : > { %p2647_p11 = pnand %p2646_p9, %p3653_p10  ;;  %p2653_p4 = scmp.lt.s32.totalorder %s2651_s29, %s2645_s1 }
  0x4d   : > { %p2648_p12 = pneg %p2647_p11  ;;  %p2654_p1 = por %p2653_p4, %p2652_p13 }
  0x4f   : > { %p2655_p2 = pnand %p2654_p1, %p2648_p12 }
  0x51   : > { %2658 = shalt.err (!%p2655_p2)  }
  0x52   : > { %2542 = dma.hbm_to_vmem [thread:$0]  (%p3653_p10), %s2914_s24, 2560, %s140_s8, %s2930_s9 }
  0x53   : > { %s157_s30 = scalar_lea.vmem [#allocation2], %s2924_s4  ;;  %s3662_s10 = ssub.s32 1, %s3685_s11 }
  0x54   : > { %s166_s6 = sshll.u32 %s157_s30, 4  ;;  %s158_s1 = scalar_lea.sflag [#allocation4], %s3662_s10  ;;  %s167_s6 = int_to_ptr.vmem [resolvable:$true] %s166_s6 }
  0x55   : > { %s2687_s5 = scalar_lea.hbm %s2914_s24, 4608  ;;  %p3663_p0 = scmp.lt.s32.totalorder %s2850_s17, 2 }
  0x56   : > { %p2660_p4 = scmp.ne.s32.totalorder %s2920_s25, %s2687_s5  ;;  %p2664_p6 = scmp.lt.u32.totalorder %s2920_s25, %s3645_s0 }
  0x57   : > { %s3664_s26 = scalar_lea.hbm %s3645_s0, 9216  ;;  %p2667_p11 = scmp.lt.u32.totalorder %s2687_s5, %s2920_s25 }
  0x58   : > { %p2661_p3 = pnand %p2660_p4, %p3663_p0  ;;  %p2665_p7 = scmp.lt.u32.totalorder %s3664_s26, %s2687_s5 }
  0x5a   : > { %p2662_p5 = pneg %p2661_p3  ;;  %p2666_p9 = por %p2665_p7, %p2664_p6 }
  0x5c   : > { %p2668_p12 = por %p2667_p11, %p2666_p9 }
  0x5e   : > { %p2669_p13 = pnand %p2668_p12, %p2662_p5 }
  0x60   : > { %2672 = shalt.err (!%p2669_p13)  }
  0x61   : > { %s2673_s11 = scalar_lea.vmem %s167_s6, 2560  ;;  %p3665_p2 = pmov %p3663_p0 }
  0x62   : > { %p2674_p1 = scmp.ne.s32.totalorder %s167_s6, %s2673_s11  ;;  %p2680_p3 = scmp.lt.s32.totalorder %s167_s6, %s2950_s21 }
  0x63   : > { %p2681_p10 = scmp.lt.s32.totalorder %s2651_s29, %s2673_s11 }
  0x64   : > { %p2675_p4 = pnand %p2674_p1, %p3665_p2 }
  0x65   : > { %p2682_p8 = por %p2681_p10, %p2680_p3 }
  0x66   : > { %p2676_p0 = pneg %p2675_p4 }
  0x68   : > { %p2683_p6 = pnand %p2682_p8, %p2676_p0 }
  0x6a   : > { %2686 = shalt.err (!%p2683_p6)  }
  0x6b   : > { %p3666_p7 = pmov %p3665_p2  ;;  %s3667_s18 = sshll.u32 %s2882_s28, 6 }
  0x6c   : > { %s2982_s20 = scalar_lea.vmem [#allocation5], %s3667_s18  ;;  %s3668_s26 = sshll.u32 %s2882_s28, 1 }
  0x6d   : > { %2544 = dma.hbm_to_vmem [thread:$0]  (%p3666_p7), %s2920_s25, 2560, %s167_s6, %s158_s1 }
  0x6e   : > { %s2986_s24 = scalar_lea.vmem [#allocation7], %s3668_s26 }
  0x6f   : > { %2764 = dma.done.wait %s2930_s9, 2560 }
  0x70   : > { %2765 = vsyncadd %s2930_s9, 4294964736  ;;  %p3669_p10 = scmp.eq.s32.totalorder %s2788_s14, 0 }
  0x72   : > { %2767 = dma.done.wait (%p3669_p10), [#allocation4 + $0x2], 9216  ;;  %p3670_p8 = pmov %p3669_p10 }
  0x73   : > { %v523_v0 = vld [vmem:[#allocation3 + $0x100] sm:$0xff]  ;;  %v524_v3 = vld [vmem:[#allocation3 + $0x108] sm:$0xff]  ;;  %v525_v6 = vld [vmem:[#allocation3 + $0x110] sm:$0xff]  ;;  %vm372_vm0 = vcmask 1046528   ;;  %vm208_vm1 = vsmask.f32 7424 }
  0x74   : > { %2769 = vsyncadd (%p3670_p8), [#allocation4 + $0x2], 4294958080  ;;  %v2994_v1 = vld [vmem:[#allocation3 + $0x140] sm:$0xff]  ;;  %1868 = vmatprep.subr.bf16.mxu0 %v523_v0  ;;  %v2997_v4 = vld [vmem:[#allocation3 + $0x148] sm:$0xff]  ;;  %vm353_vm2 = vcmask 1047552   ;;  %s1791_s17 = sshll.u32 %s2788_s14, 4 }
  0x75   : > { %v515_v2 = vld [vmem:[#allocation3 + $0xc0] sm:$0xff]  ;;  %2420 = vmatprep.subr.bf16.mxu1 %v2994_v1  ;;  %v516_v5 = vld [vmem:[#allocation3 + $0xc8] sm:$0xff]  ;;  %v3001_v7 = vld [vmem:[#allocation3 + $0x150] sm:$0xff]  ;;  %s1792_s25 = sshll.u32 %s2792_s15, 5  ;;  %s1592_s29 = scalar_lea.sflag [#allocation6], %s2882_s28 }
  0x76   : > { %1869 = vmatpush3.bf16.msra.mxu0 %v515_v2  ;;  %2428 = vmatpush3.bf16.msra.mxu1 %v2994_v1  ;;  %v517_v8 = vld [vmem:[#allocation3 + $0xd0] sm:$0xff]  ;;  %v526_v9 = vld [vmem:[#allocation3 + $0x118] sm:$0xff]  ;;  %v527_v23 = vld [vmem:[#allocation3 + $0x120] sm:$0xff]  ;;  %s1609_s4 = sadd.s32 %s1792_s25, %s1791_s17  ;;  %p3673_p9 = scmp.ne.s32.totalorder %s3660_s27, 0 }
  0x77   : > { %1870 = vmatprep.subr.bf16.mxu0 %v524_v3  ;;  %2421 = vmatprep.subr.bf16.mxu1 %v2997_v4  ;;  %v3005_v10 = vld [vmem:[#allocation3 + $0x158] sm:$0xff]  ;;  %v3008_v11 = vld [vmem:[%s2926_s7 + $0x10] sm:$0xff]  ;;  %v3028_v24 = vld [vmem:[#allocation3 + $0x160] sm:$0xff]  ;;  %s1793_s8 = sshll.u32 %s1609_s4, 6  ;;  %s2800_s6 = smov [#allocation5]  }
  0x78   : > { %v3011_v12 = vld [vmem:[%s2926_s7 + $0x18] sm:$0xff]  ;;  %v3014_v13 = vld [vmem:[%s2926_s7 + $0x50] sm:$0xff]  ;;  %v225_v14 = vshll.u32 %v3008_v11, 16  ;;  %v229_v15 = vshrl.u32 %v3008_v11, 16  ;;  %v519_v27 = vld [vmem:[#allocation3 + $0xe0] sm:$0xff]  ;;  %s3566_s21 = scalar_lea.hbm %s3647_s2, %s1793_s8  ;;  %s2692_s10 = sshll.u32 %s2800_s6, 4  ;;  %s2693_s10 = int_to_ptr.vmem [resolvable:$false] %s2692_s10 }
  0x79   : > { %v233_v16 = vshll.u32 %v3011_v12, 16  ;;  %v3020_v17 = vld [vmem:[%s2926_s7 + $0x58] sm:$0xff]  ;;  %v392_v18 = vrot.slane %v3014_v13, 1  ;;  %v528_v29 = vld [vmem:[#allocation3 + $0x128] sm:$0xff]  ;;  %v529_v32 = vld [vmem:[#allocation3 + $0x130] sm:$0xff]  ;;  %v237_v39 = vshrl.u32 %v3011_v12, 16 }
  0x7a   : > { %1871 = vmatpush3.bf16.msra.mxu0 %v516_v5  ;;  %2429 = vmatpush3.bf16.msra.mxu1 %v2997_v4  ;;  %v394_v19 = vrot.slane %v3020_v17, 1  ;;  %v518_v20 = vld [vmem:[#allocation3 + $0xd8] sm:$0xff]  ;;  %v3026_v21 = vrot.slane %v225_v14, 1  ;;  %v3042_v30 = vld [vmem:[#allocation3 + $0x168] sm:$0xff]  ;;  %v3047_v33 = vld [vmem:[#allocation3 + $0x170] sm:$0xff]  ;;  %s2694_s1 = scalar_lea.vmem %s2693_s10, 2048 }
  0x7b   : > { %1872 = vmatprep.subr.bf16.mxu0 %v525_v6  ;;  %2422 = vmatprep.subr.bf16.mxu1 %v3001_v7  ;;  %v235_v22 = vrot.slane %v233_v16, 1  ;;  %v520_v31 = vld [vmem:[#allocation3 + $0xe8] sm:$0xff]  ;;  %v3050_v34 = vld [vmem:[%s2926_s7 + $0x20] sm:$0xff]  ;;  %v521_v35 = vld [vmem:[#allocation3 + $0xf0] sm:$0xff] }
  0x7c   : > { %v3033_v25 = vsel %vm372_vm0, %v392_v18, %v394_v19  ;;  %v231_v26 = vor.u32 %v229_v15, %v3026_v21  ;;  %v3055_v36 = vld [vmem:[%s2926_s7 + $0x60] sm:$0xff]  ;;  %v530_v37 = vld [vmem:[#allocation3 + $0x138] sm:$0xff]  ;;  %v241_v40 = vshll.u32 %v3050_v34, 16  ;;  %v3064_v42 = vld [vmem:[%s2926_s7 + $0x68] sm:$0xff]  ;;  %v245_v52 = vshrl.u32 %v3050_v34, 16 }
  0x7d   : > { %2308 = vmatprep.mubr.bf16.mxu1 %v3033_v25  ;;  %v3057_v38 = vld [vmem:[#allocation3 + $0x178] sm:$0xff]  ;;  %v396_v41 = vrot.slane %v3055_v36, 1  ;;  %v498_v44 = vld [vmem:[#allocation3 + $0x40] sm:$0xff]  ;;  %v239_v45 = vor.u32 %v237_v39, %v235_v22  ;;  %v3070_v47 = vld [vmem:[%s2926_s7 + $0x28] sm:$0xff]  ;;  %v398_v48 = vrot.slane %v3064_v42, 1 }
  0x7e   : > { %1873 = vmatpush3.bf16.msra.mxu0 %v517_v8  ;;  %2430 = vmatpush3.bf16.msra.mxu1 %v3001_v7  ;;  %v3040_v28 = vsel %vm208_vm1, %v231_v26, %v235_v22  ;;  %v522_v43 = vld [vmem:[#allocation3 + $0xf8] sm:$0xff]  ;;  %v3067_v46 = vrot.slane %v241_v40, 1  ;;  %v490_v50 = vld [vmem:[#allocation3] sm:$0xff]  ;;  %v3079_v51 = vld [vmem:[%s2926_s7 + $0x70] sm:$0xff]  ;;  %v249_v53 = vshll.u32 %v3070_v47, 16  ;;  %v253_v6 = vshrl.u32 %v3070_v47, 16 }
  0x7f   : > { %1874 = vmatprep.subr.bf16.mxu0 %v526_v9  ;;  %2423 = vmatprep.subr.bf16.mxu1 %v3005_v10  ;;  %v3075_v49 = vsel %vm372_vm0, %v394_v19, %v396_v41  ;;  %v499_v54 = vld [vmem:[#allocation3 + $0x48] sm:$0xff]  ;;  %v3090_v56 = vsel %vm372_vm0, %v396_v41, %v398_v48  ;;  %v3093_v57 = vld [vmem:[%s2926_s7 + $0x78] sm:$0xff]  ;;  %v400_v58 = vrot.slane %v3079_v51, 1  ;;  %v500_v62 = vld [vmem:[#allocation3 + $0x50] sm:$0xff] }
  0x80   : > { %571 = vmatprep.mubr.bf16.mxu0 %v3040_v28  ;;  %v3085_v55 = vsel %vm208_vm1, %v239_v45, %v3067_v46  ;;  %v491_v59 = vld [vmem:[#allocation3 + $0x8] sm:$0xff]  ;;  %v247_v60 = vor.u32 %v245_v52, %v3067_v46  ;;  %v251_v61 = vrot.slane %v249_v53, 1  ;;  %v3101_v63 = vrot.slane %v3093_v57, 1  ;;  %v3105_v0 = vld [vmem:[%s2926_s7 + $0x30] sm:$0xff]  ;;  %v3115_v5 = vld [vmem:[%s2926_s7 + $0x80] sm:$0xff] }
  0x81   : > { %v492_v2 = vld [vmem:[#allocation3 + $0x10] sm:$0xff]  ;;  %v257_v8 = vshll.u32 %v3105_v0, 16  ;;  %v501_v9 = vld [vmem:[#allocation3 + $0x58] sm:$0xff]  ;;  %v3130_v15 = vld [vmem:[%s2926_s7] sm:$0xff]  ;;  %v447_v16 = vrot.slane %v3115_v5, 1  ;;  %v261_v39 = vshrl.u32 %v3105_v0, 16 }
  0x82   : > { %1875 = vmatpush3.bf16.msra.mxu0 %v518_v20  ;;  %2431 = vmatpush3.bf16.msra.mxu1 %v3005_v10  ;;  %v3112_v3 = vsel %vm208_vm1, %v247_v60, %v251_v61  ;;  %v3122_v14 = vsel %vm372_vm0, %v400_v58, %v3101_v63  ;;  %v493_v19 = vld [vmem:[#allocation3 + $0x18] sm:$0xff]  ;;  %v255_v20 = vor.u32 %v253_v6, %v251_v61  ;;  %v503_v41 = vld [vmem:[#allocation3 + $0x68] sm:$0xff]  ;;  %v496_v61 = vld [vmem:[#allocation3 + $0x30] sm:$0xff] }
  0x83   : > { %1876 = vmatprep.subr.bf16.mxu0 %v527_v23  ;;  %2424 = vmatprep.subr.bf16.mxu1 %v3028_v24  ;;  %v259_v22 = vrot.slane %v257_v8, 1  ;;  %v502_v23 = vld [vmem:[#allocation3 + $0x60] sm:$0xff]  ;;  %v505_v8 = vld [vmem:[#allocation3 + $0x78] sm:$0xff]  ;;  %vm3309_vm3 = vmand %vm353_vm2, %vm208_vm1 }
  0x85   : > { %v263_v52 = vor.u32 %v261_v39, %v259_v22 }
  0x86   : > { %1877 = vmatpush3.bf16.msra.mxu0 %v519_v27  ;;  %2432 = vmatpush3.bf16.msra.mxu1 %v3028_v24  ;;  %v3139_v27 = vld [vmem:[%s2926_s7 + $0x38] sm:$0xff] }
  0x87   : > { %1878 = vmatprep.subr.bf16.mxu0 %v528_v29  ;;  %2425 = vmatprep.subr.bf16.mxu1 %v3042_v30  ;;  %v212_v29 = vshll.u32 %v3130_v15, 16  ;;  %v265_v40 = vshll.u32 %v3139_v27, 16 }
  0x89   : > { %v267_v53 = vrot.slane %v265_v40, 1 }
  0x8a   : > { %1879 = vmatpush3.bf16.msra.mxu0 %v520_v31  ;;  %2433 = vmatpush3.bf16.msra.mxu1 %v3042_v30  ;;  %v3144_v31 = vld [vmem:[%s2926_s7 + $0x8] sm:$0xff] }
  0x8b   : > { %1880 = vmatprep.subr.bf16.mxu0 %v529_v32  ;;  %2426 = vmatprep.subr.bf16.mxu1 %v3047_v33  ;;  %v3149_v32 = vsel %vm372_vm0, %v3101_v63, %v447_v16  ;;  %v217_v45 = vshll.u32 %v3144_v31, 16  ;;  %v374_v39 = vrot.slane %v3144_v31, 1 }
  0x8e   : > { %1881 = vmatpush3.bf16.msra.mxu0 %v521_v35  ;;  %2434 = vmatpush3.bf16.msra.mxu1 %v3047_v33  ;;  %v494_v35 = vld [vmem:[#allocation3 + $0x20] sm:$0xff] }
  0x8f   : > { %1882 = vmatprep.subr.bf16.mxu0 %v530_v37  ;;  %2427 = vmatprep.subr.bf16.mxu1 %v3057_v38  ;;  %v3152_v37 = vsel %vm208_vm1, %v255_v20, %v259_v22  ;;  %v506_v22 = vld [vmem:[#allocation3 + $0x80] sm:$0xff] }
  0x92   : > { %1883 = vmatpush3.bf16.msra.mxu0 %v522_v43  ;;  %2435 = vmatpush3.bf16.msra.mxu1 %v3057_v38  ;;  %v210_v43 = vshrl.u32 %v3130_v15, 16 }
  0x93   : > { %2004 = vmatprep.subr.bf16.mxu1 %v498_v44  ;;  %2276 = vmatprep.subr.bf16.mxu0 %v2994_v1  ;;  %v3161_v44 = vrot.slane %v212_v29, 1  ;;  %v3192_v29 = vld [vmem:[%s2926_s7 + $0x48] sm:$0xff] }
  0x95   : > { %572 = vmatmul.mubr.bf16.vlgmr.msra.gmra.mrb[0].mxu0 %v3008_v11  ;;  %2309 = vmatmul.mubr.bf16.vlgmr.msra.gmra.mrb[0].mxu1 %v3075_v49 }
  0x96   : > { %2005 = vmatpush3.bf16.msra.mxu1 %v490_v50  ;;  %2277 = vmatpush3.bf16.msra.mxu0 %v2994_v1  ;;  %v3108_v1 = vsel %vm372_vm0, %v398_v48, %v400_v58  ;;  %v3169_v48 = vrot.slane %v3008_v11, 1  ;;  %v495_v50 = vld [vmem:[#allocation3 + $0x28] sm:$0xff]  ;;  %v215_v58 = vor.u32 %v3161_v44, %v210_v43  ;;  %v281_v43 = vshll.u32 %v3192_v29, 16 }
  0x97   : > { %2006 = vmatprep.subr.bf16.mxu1 %v499_v54  ;;  %579 = vmatprep.mubr.bf16.mxu0 %v3085_v55  ;;  %v504_v54 = vld [vmem:[#allocation3 + $0x70] sm:$0xff] }
  0x98   : > { %2312 = vmatprep.mubr.bf16.mxu1 %v3090_v56  ;;  %2278 = vmatprep.subr.bf16.mxu0 %v2997_v4 }
  0x9a   : > { %2007 = vmatpush3.bf16.msra.mxu1 %v491_v59  ;;  %2279 = vmatpush3.bf16.msra.mxu0 %v2997_v4  ;;  %v3127_v4 = vld [vmem:[%s2926_s7 + $0x88] sm:$0xff]  ;;  %v3174_v59 = vld [vmem:[%s2926_s7 + $0x40] sm:$0xff] }
  0x9b   : > { %2008 = vmatprep.subr.bf16.mxu1 %v500_v62  ;;  %2280 = vmatprep.subr.bf16.mxu0 %v3001_v7  ;;  %v3136_v26 = vrot.slane %v3127_v4, 1  ;;  %v3183_v62 = vsel %vm208_vm1, %v263_v52, %v267_v53  ;;  %v273_v6 = vshll.u32 %v3174_v59, 16  ;;  %v277_v40 = vshrl.u32 %v3174_v59, 16  ;;  %v507_v52 = vld [vmem:[#allocation3 + $0x88] sm:$0xff] }
  0x9d   : > { %580 = vmatmul.mubr.bf16.gmra.mrb[4].mxu0 %v3011_v12  ;;  %2313 = vmatmul.mubr.bf16.gmra.mrb[4].mxu1 %v3108_v1  ;;  %v455_v60 = vsel %vm372_vm0, %v3136_v26, %v3169_v48  ;;  %v275_v20 = vrot.slane %v273_v6, 1 }
  0x9e   : > { %2009 = vmatpush3.bf16.msra.mxu1 %v492_v2  ;;  %585 = vmatprep.mubr.bf16.mxu0 %v3112_v3  ;;  %v269_v2 = vshrl.u32 %v3139_v27, 16 }
  0x9f   : > { %2010 = vmatprep.subr.bf16.mxu1 %v501_v9  ;;  %2316 = vmatprep.mubr.bf16.mxu1 %v3122_v14  ;;  %v221_v9 = vshrl.u32 %v3144_v31, 16 }
  0xa0   : > { %2281 = vmatpush3.bf16.msra.mxu0 %v3001_v7  ;;  %v3158_v7 = vsel %vm372_vm0, %v447_v16, %v3136_v26  ;;  %v497_v16 = vld [vmem:[#allocation3 + $0x38] sm:$0xff] }
  0xa1   : > { %2282 = vmatprep.subr.bf16.mxu0 %v3005_v10 }
  0xa2   : > { %2011 = vmatpush3.bf16.msra.mxu1 %v493_v19  ;;  %v271_v19 = vor.u32 %v269_v2, %v267_v53  ;;  %v279_v53 = vor.u32 %v277_v40, %v275_v20  ;;  %v509_v2 = vld [vmem:[#allocation3 + $0x98] sm:$0xff] }
  0xa3   : > { %2012 = vmatprep.subr.bf16.mxu1 %v502_v23 }
  0xa4   : > { %2283 = vmatpush3.bf16.msra.mxu0 %v3005_v10  ;;  %v219_v10 = vrot.slane %v217_v45, 1 }
  0xa5   : > { %586 = vmatmul.mubr.bf16.gmra.mrb[8].mxu0 %v3050_v34  ;;  %2317 = vmatmul.mubr.bf16.gmra.mrb[8].mxu1 %v3149_v32 }
  0xa6   : > { %2013 = vmatpush3.bf16.msra.mxu1 %v494_v35  ;;  %593 = vmatprep.mubr.bf16.mxu0 %v3152_v37  ;;  %v223_v23 = vor.u32 %v221_v9, %v219_v10  ;;  %v373_v35 = vrot.slane %v3130_v15, 1  ;;  %v293_v9 = vshrl.u32 %v3014_v13, 16 }
  0xa7   : > { %2014 = vmatprep.subr.bf16.mxu1 %v503_v41  ;;  %2320 = vmatprep.mubr.bf16.mxu1 %v3158_v7  ;;  %v3200_v41 = vsel %vm208_vm1, %v271_v19, %v275_v20  ;;  %v512_v20 = vld [vmem:[#allocation3 + $0xb0] sm:$0xff] }
  0xa8   : > { %2284 = vmatprep.subr.bf16.mxu0 %v3028_v24  ;;  %v3206_v45 = vsel %vm372_vm0, %v373_v35, %v374_v39 }
  0xa9   : > { %2285 = vmatpush3.bf16.msra.mxu0 %v3028_v24  ;;  %v220_v24 = vsel %vm208_vm1, %v215_v58, %v219_v10  ;;  %v1128_v58 = vld [vmem:[#allocation3 + $0x1c0] sm:$0xff]  ;;  %v508_v10 = vld [vmem:[#allocation3 + $0x90] sm:$0xff] }
  0xaa   : > { %2015 = vmatpush3.bf16.msra.mxu1 %v495_v50  ;;  %2286 = vmatprep.subr.bf16.mxu0 %v3042_v30  ;;  %v228_v50 = vsel %vm208_vm1, %v223_v23, %v3026_v21  ;;  %v301_v23 = vshrl.u32 %v3020_v17, 16 }
  0xab   : > { %2016 = vmatprep.subr.bf16.mxu1 %v504_v54  ;;  %v283_v54 = vrot.slane %v281_v43, 1  ;;  %v3247_v43 = vld [vmem:[#allocation3 + $0x200] sm:$0xff] }
  0xad   : > { %594 = vmatmul.mubr.bf16.gmra.mrb[12].mxu0 %v3070_v47  ;;  %2321 = vmatmul.mubr.bf16.gmra.mrb[12].mxu1 %v455_v60  ;;  %v285_v60 = vshrl.u32 %v3192_v29, 16 }
  0xae   : > { %2017 = vmatpush3.bf16.msra.mxu1 %v496_v61  ;;  %599 = vmatprep.mubr.bf16.mxu0 %v3183_v62  ;;  %v289_v61 = vshll.u32 %v3014_v13, 16 }
  0xaf   : > { %2018 = vmatprep.subr.bf16.mxu1 %v505_v8  ;;  %861 = vmatprep.mubr.bf16.mxu1 %v220_v24  ;;  %v510_v8 = vld [vmem:[#allocation3 + $0xa0] sm:$0xff] }
  0xb0   : > { %2287 = vmatpush3.bf16.msra.mxu0 %v3042_v30  ;;  %v3210_v30 = vsel %vm372_vm0, %v374_v39, %v3169_v48  ;;  %v291_v6 = vrot.slane %v289_v61, 1  ;;  %v305_v39 = vshll.u32 %v3055_v36, 16  ;;  %v321_v61 = vshll.u32 %v3079_v51, 16 }
  0xb1   : > { %2288 = vmatprep.subr.bf16.mxu0 %v3047_v33 }
  0xb2   : > { %2019 = vmatpush3.bf16.msra.mxu1 %v497_v16  ;;  %v297_v16 = vshll.u32 %v3020_v17, 16  ;;  %v307_v40 = vrot.slane %v305_v39, 1 }
  0xb3   : > { %2324 = vmatprep.subr.bf16.mxu1 %v506_v22 }
  0xb4   : > { %2289 = vmatpush3.bf16.msra.mxu0 %v3047_v33  ;;  %v3221_v33 = vsel %vm208_vm1, %v279_v53, %v283_v54  ;;  %v299_v19 = vrot.slane %v297_v16, 1  ;;  %v313_v53 = vshll.u32 %v3064_v42, 16 }
  0xb5   : > { %600 = vmatmul.mubr.bf16.gmra.mrb[16].mxu0 %v3105_v0  ;;  %862 = vmatmul.mubr.bf16.vlgmr.msra.gmra.mrb[16].mxu1 %v3130_v15 }
  0xb6   : > { %2325 = vmatpush3.bf16.msra.mxu1 %v506_v22  ;;  %607 = vmatprep.mubr.bf16.mxu0 %v3200_v41 }
  0xb7   : > { %869 = vmatprep.mubr.bf16.mxu1 %v228_v50  ;;  %2326 = vmatprep.subr.bf16.mxu1 %v507_v52 }
  0xb8   : > { %2290 = vmatprep.subr.bf16.mxu0 %v3057_v38 }
  0xb9   : > { %2291 = vmatpush3.bf16.msra.mxu0 %v3057_v38  ;;  %v287_v38 = vor.u32 %v285_v60, %v283_v54  ;;  %v317_v60 = vshrl.u32 %v3064_v42, 16 }
  0xba   : > { %2327 = vmatpush3.bf16.msra.mxu1 %v507_v52  ;;  %2140 = vmatprep.subr.bf16.mxu0 %v1128_v58  ;;  %v309_v52 = vshrl.u32 %v3055_v36, 16  ;;  %v315_v58 = vrot.slane %v313_v53, 1 }
  0xbb   : > { %2328 = vmatprep.subr.bf16.mxu1 %v508_v10  ;;  %v3230_v24 = vsel %vm208_vm1, %v287_v38, %v291_v6  ;;  %v323_v38 = vrot.slane %v321_v61, 1 }
  0xbc   : > { %v311_v54 = vor.u32 %v309_v52, %v307_v40 }
  0xbd   : > { %608 = vmatmul.mubr.bf16.gmra.mrb[20].mxu0 %v3139_v27  ;;  %870 = vmatmul.mubr.bf16.gmra.mrb[20].mxu1 %v3144_v31  ;;  %v511_v31 = vld [vmem:[#allocation3 + $0xa8] sm:$0xff] }
  0xbe   : > { %613 = vmatprep.mubr.bf16.mxu0 %v3221_v33  ;;  %875 = vmatprep.mubr.bf16.mxu1 %v3040_v28  ;;  %v295_v28 = vor.u32 %v293_v9, %v291_v6  ;;  %v329_v9 = vshll.u32 %v3093_v57, 16 }
  0xbf   : > { %2329 = vmatpush3.bf16.msra.mxu1 %v508_v10  ;;  %v3260_v10 = vsel %vm208_vm1, %v311_v54, %v315_v58 }
  0xc0   : > { %2330 = vmatprep.subr.bf16.mxu1 %v509_v2  ;;  %v3239_v22 = vsel %vm208_vm1, %v295_v28, %v299_v19 }
  0xc3   : > { %2331 = vmatpush3.bf16.msra.mxu1 %v509_v2  ;;  %v319_v2 = vor.u32 %v317_v60, %v315_v58  ;;  %v437_v58 = vshrl.u32 %v3127_v4, 16 }
  0xc4   : > { %2332 = vmatprep.subr.bf16.mxu1 %v510_v8 }
  0xc5   : > { %614 = vmatmul.mubr.bf16.gmra.mrb[24].mxu0 %v3174_v59  ;;  %876 = vmatmul.mubr.bf16.gmra.mrb[24].mxu1 %v3008_v11  ;;  %v513_v11 = vld [vmem:[#allocation3 + $0xb8] sm:$0xff]  ;;  %v3269_v6 = vsel %vm208_vm1, %v319_v2, %v323_v38 }
  0xc6   : > { %621 = vmatprep.mubr.bf16.mxu0 %v3230_v24  ;;  %883 = vmatprep.mubr.bf16.mxu1 %v3085_v55  ;;  %v303_v55 = vor.u32 %v301_v23, %v299_v19  ;;  %v333_v19 = vshrl.u32 %v3093_v57, 16 }
  0xc7   : > { %2333 = vmatpush3.bf16.msra.mxu1 %v510_v8  ;;  %v325_v8 = vshrl.u32 %v3079_v51, 16 }
  0xc8   : > { %2334 = vmatprep.subr.bf16.mxu1 %v511_v31  ;;  %v3250_v50 = vsel %vm208_vm1, %v303_v55, %v307_v40  ;;  %v429_v55 = vshrl.u32 %v3115_v5, 16  ;;  %v433_v40 = vshll.u32 %v3127_v4, 16 }
  0xc9   : > { %v327_v16 = vor.u32 %v325_v8, %v323_v38  ;;  %v378_v38 = vrot.slane %v3011_v12, 1 }
  0xca   : > { %v435_v53 = vrot.slane %v433_v40, 1 }
  0xcb   : > { %2335 = vmatpush3.bf16.msra.mxu1 %v511_v31  ;;  %v331_v31 = vrot.slane %v329_v9, 1  ;;  %v3323_v8 = vsel %vm372_vm0, %v3169_v48, %v378_v38  ;;  %v382_v9 = vrot.slane %v3070_v47, 1 }
  0xcc   : > { %2336 = vmatprep.subr.bf16.mxu1 %v512_v20  ;;  %v3306_v60 = vor.u32 %v437_v58, %v435_v53  ;;  %v1131_v58 = vld [vmem:[#allocation3 + $0x1d8] sm:$0xff] }
  0xcd   : > { %622 = vmatmul.mubr.bf16.gmra.mrb[28].mxu0 %v3192_v29  ;;  %884 = vmatmul.mubr.bf16.gmra.mrb[28].mxu1 %v3011_v12  ;;  %v3278_v28 = vsel %vm208_vm1, %v327_v16, %v331_v31  ;;  %v3286_v23 = vor.u32 %v333_v19, %v331_v31  ;;  %v1120_v16 = vld [vmem:[#allocation3 + $0x180] sm:$0xff]  ;;  %v1129_v31 = vld [vmem:[#allocation3 + $0x1c8] sm:$0xff]  ;;  %v384_v19 = vrot.slane %v3105_v0, 1 }
  0xce   : > { %627 = vmatprep.mubr.bf16.mxu0 %v3239_v22  ;;  %889 = vmatprep.mubr.bf16.mxu1 %v3112_v3  ;;  %v444_v2 = vsel %vm3309_vm3, %v3306_v60, %v3026_v21  ;;  %v3330_v21 = vrot.slane %v3050_v34, 1 }
  0xcf   : > { %2337 = vmatpush3.bf16.msra.mxu1 %v512_v20  ;;  %v425_v20 = vshll.u32 %v3115_v5, 16  ;;  %v3348_v40 = vsel %vm372_vm0, %v382_v9, %v384_v19 }
  0xd0   : > { %2338 = vmatprep.subr.bf16.mxu1 %v513_v11  ;;  %v3335_v12 = vsel %vm372_vm0, %v378_v38, %v3330_v21  ;;  %v3339_v48 = vsel %vm372_vm0, %v3330_v21, %v382_v9  ;;  %v1123_v38 = vld [vmem:[#allocation3 + $0x198] sm:$0xff]  ;;  %v390_v9 = vrot.slane %v3192_v29, 1 }
  0xd1   : > { %v427_v39 = vrot.slane %v425_v20, 1  ;;  %v1121_v20 = vld [vmem:[#allocation3 + $0x188] sm:$0xff] }
  0xd3   : > { %2339 = vmatpush3.bf16.msra.mxu1 %v513_v11  ;;  %v3290_v11 = vsel %vm208_vm1, %v3286_v23, %v427_v39  ;;  %v431_v52 = vor.u32 %v429_v55, %v427_v39  ;;  %v386_v39 = vrot.slane %v3139_v27, 1  ;;  %v1130_v55 = vld [vmem:[#allocation3 + $0x1d0] sm:$0xff] }
  0xd4   : > { %2372 = vmatprep.subr.bf16.mxu1 %v3247_v43 }
  0xd5   : > { %628 = vmatmul.mubr.bf16.gmra.mrb[32].mxu0 %v3014_v13  ;;  %890 = vmatmul.mubr.bf16.gmra.mrb[32].mxu1 %v3050_v34  ;;  %v3299_v54 = vsel %vm208_vm1, %v431_v52, %v435_v53  ;;  %v1122_v52 = vld [vmem:[#allocation3 + $0x190] sm:$0xff]  ;;  %v3351_v53 = vsel %vm372_vm0, %v384_v19, %v386_v39  ;;  %v1124_v19 = vld [vmem:[#allocation3 + $0x1a0] sm:$0xff] }
  0xd6   : > { %635 = vmatprep.mubr.bf16.mxu0 %v3250_v50  ;;  %897 = vmatprep.mubr.bf16.mxu1 %v3152_v37 }
  0xdd   : > { %636 = vmatmul.mubr.bf16.gmra.mrb[36].mxu0 %v3020_v17  ;;  %898 = vmatmul.mubr.bf16.gmra.mrb[36].mxu1 %v3070_v47 }
  0xde   : > { %641 = vmatprep.mubr.bf16.mxu0 %v3260_v10  ;;  %903 = vmatprep.mubr.bf16.mxu1 %v3183_v62 }
  0xe5   : > { %642 = vmatmul.mubr.bf16.gmra.mrb[40].mxu0 %v3055_v36  ;;  %904 = vmatmul.mubr.bf16.gmra.mrb[40].mxu1 %v3105_v0 }
  0xe6   : > { %649 = vmatprep.mubr.bf16.mxu0 %v3269_v6  ;;  %911 = vmatprep.mubr.bf16.mxu1 %v3200_v41 }
  0xed   : > { %650 = vmatmul.mubr.bf16.gmra.mrb[44].mxu0 %v3064_v42  ;;  %912 = vmatmul.mubr.bf16.gmra.mrb[44].mxu1 %v3139_v27 }
  0xee   : > { %655 = vmatprep.mubr.bf16.mxu0 %v3278_v28  ;;  %917 = vmatprep.mubr.bf16.mxu1 %v3221_v33 }
  0xf5   : > { %656 = vmatmul.mubr.bf16.gmra.mrb[48].mxu0 %v3079_v51  ;;  %918 = vmatmul.mubr.bf16.gmra.mrb[48].mxu1 %v3174_v59 }
  0xf6   : > { %663 = vmatprep.mubr.bf16.mxu0 %v3290_v11  ;;  %925 = vmatprep.mubr.bf16.mxu1 %v3230_v24 }
  0xfd   : > { %664 = vmatmul.mubr.bf16.gmra.mrb[52].mxu0 %v3093_v57  ;;  %926 = vmatmul.mubr.bf16.gmra.mrb[52].mxu1 %v3192_v29 }
  0xfe   : > { %669 = vmatprep.mubr.bf16.mxu0 %v3299_v54  ;;  %931 = vmatprep.mubr.bf16.mxu1 %v3239_v22 }
 0x105   : > { %670 = vmatmul.mubr.bf16.gmra.mrb[56].mxu0 %v3115_v5  ;;  %932 = vmatmul.mubr.bf16.gmra.mrb[56].mxu1 %v3014_v13 }
 0x106   : > { %677 = vmatprep.mubr.bf16.mxu0 %v444_v2  ;;  %939 = vmatprep.mubr.bf16.mxu1 %v3250_v50  ;;  %v388_v2 = vrot.slane %v3174_v59, 1 }
 0x10d   : > { %678 = vmatmul.mubr.bf16.gmra.mrb[60].mxu0 %v3127_v4  ;;  %940 = vmatmul.mubr.bf16.gmra.mrb[60].mxu1 %v3020_v17 }
 0x10e   : > { %2292 = vmatprep.mubr.bf16.mxu0 %v3323_v8  ;;  %945 = vmatprep.mubr.bf16.mxu1 %v3260_v10 }
 0x115   : > { %2293 = vmatmul.mubr.bf16.vlgmr.msra.gmra.mrb[64].mxu0 %v3335_v12  ;;  %946 = vmatmul.mubr.bf16.gmra.mrb[64].mxu1 %v3055_v36 }
 0x116   : > { %2141 = vmatpush3.bf16.msra.mxu0 %v1120_v16  ;;  %2296 = vmatprep.mubr.bf16.mxu0 %v3339_v48  ;;  %v1132_v16 = vld [vmem:[#allocation3 + $0x1e0] sm:$0xff] }
 0x117   : > { %2142 = vmatprep.subr.bf16.mxu0 %v1129_v31  ;;  %953 = vmatprep.mubr.bf16.mxu1 %v3269_v6  ;;  %v3360_v31 = vsel %vm372_vm0, %v386_v39, %v388_v2  ;;  %v1125_v39 = vld [vmem:[#allocation3 + $0x1a8] sm:$0xff] }
 0x11a   : > { %2143 = vmatpush3.bf16.msra.mxu0 %v1121_v20  ;;  %v3363_v20 = vsel %vm372_vm0, %v388_v2, %v390_v9  ;;  %v3375_v2 = vsel %vm372_vm0, %v390_v9, %v392_v18  ;;  %v1138_v18 = vld [vmem:[#allocation3 + $0x210] sm:$0xff] }
 0x11b   : > { %2144 = vmatprep.subr.bf16.mxu0 %v1130_v55  ;;  %v1133_v55 = vld [vmem:[#allocation3 + $0x1e8] sm:$0xff] }
 0x11d   : > { %2297 = vmatmul.mubr.bf16.gmra.mrb[68].mxu0 %v3348_v40  ;;  %954 = vmatmul.mubr.bf16.gmra.mrb[68].mxu1 %v3064_v42 }
 0x11e   : > { %2145 = vmatpush3.bf16.msra.mxu0 %v1122_v52  ;;  %2300 = vmatprep.mubr.bf16.mxu0 %v3351_v53  ;;  %v355_v52 = vsel %vm3309_vm3, %v3286_v23, %v3161_v44  ;;  %v1135_v44 = vld [vmem:[#allocation3 + $0x1f8] sm:$0xff] }
 0x11f   : > { %2146 = vmatprep.subr.bf16.mxu0 %v1131_v58  ;;  %959 = vmatprep.mubr.bf16.mxu1 %v3278_v28  ;;  %v1134_v58 = vld [vmem:[#allocation3 + $0x1f0] sm:$0xff]  ;;  %v1127_v23 = vld [vmem:[#allocation3 + $0x1b8] sm:$0xff] }
 0x122   : > { %2147 = vmatpush3.bf16.msra.mxu0 %v1123_v38  ;;  %v1126_v38 = vld [vmem:[#allocation3 + $0x1b0] sm:$0xff] }
 0x123   : > { %2148 = vmatprep.subr.bf16.mxu0 %v1132_v16  ;;  %v1137_v16 = vld [vmem:[#allocation3 + $0x208] sm:$0xff] }
 0x125   : > { %2301 = vmatmul.mubr.bf16.gmra.mrb[72].mxu0 %v3360_v31  ;;  %960 = vmatmul.mubr.bf16.gmra.mrb[72].mxu1 %v3079_v51 }
 0x126   : > { %2149 = vmatpush3.bf16.msra.mxu0 %v1124_v19  ;;  %2304 = vmatprep.mubr.bf16.mxu0 %v3363_v20 }
 0x127   : > { %2150 = vmatprep.subr.bf16.mxu0 %v1133_v55  ;;  %967 = vmatprep.mubr.bf16.mxu1 %v355_v52 }
 0x12a   : > { %2151 = vmatpush3.bf16.msra.mxu0 %v1125_v39 }
 0x12b   : > { %2152 = vmatprep.subr.bf16.mxu0 %v1134_v58 }
 0x12d   : > { %2305 = vmatmul.mubr.bf16.gmra.mrb[76].mxu0 %v3375_v2  ;;  %968 = vmatmul.mubr.bf16.gmra.mrb[76].mxu1 %v3093_v57 }
 0x12e   : > { %2153 = vmatpush3.bf16.msra.mxu0 %v1126_v38  ;;  %2340 = vmatprep.mubr.bf16.mxu1 %v3206_v45 }
 0x12f   : > { %2154 = vmatprep.subr.bf16.mxu0 %v1135_v44  ;;  %1176 = vmatprep.mubr.bf16.mxu0 %v3112_v3  ;;  %v1139_v3 = vld [vmem:[#allocation3 + $0x218] sm:$0xff] }
 0x132   : > { %2155 = vmatpush3.bf16.msra.mxu0 %v1127_v23 }
 0x135   : > { %2341 = vmatmul.mubr.bf16.vlgmr.msra.gmra.mrb[80].mxu1 %v3210_v30  ;;  %1177 = vmatmul.mubr.bf16.vlgmr.msra.gmra.mrb[80].mxu0 %v3050_v34  ;;  %v1140_v34 = vld [vmem:[#allocation3 + $0x220] sm:$0xff] }
 0x136   : > { %2373 = vmatpush3.bf16.msra.mxu1 %v3247_v43  ;;  %2344 = vmatprep.mubr.bf16.mxu1 %v3323_v8 }
 0x137   : > { %1184 = vmatprep.mubr.bf16.mxu0 %v3152_v37  ;;  %2374 = vmatprep.subr.bf16.mxu1 %v1137_v16  ;;  %v1141_v37 = vld [vmem:[#allocation3 + $0x228] sm:$0xff] }
 0x13a   : > { %2375 = vmatpush3.bf16.msra.mxu1 %v1137_v16 }
 0x13b   : > { %2376 = vmatprep.subr.bf16.mxu1 %v1138_v18 }
 0x13d   : > { %2345 = vmatmul.mubr.bf16.gmra.mrb[84].mxu1 %v3335_v12  ;;  %1185 = vmatmul.mubr.bf16.gmra.mrb[84].mxu0 %v3070_v47  ;;  %v1142_v47 = vld [vmem:[#allocation3 + $0x230] sm:$0xff] }
 0x13e   : > { %2348 = vmatprep.mubr.bf16.mxu1 %v3339_v48  ;;  %1190 = vmatprep.mubr.bf16.mxu0 %v3183_v62  ;;  %v1143_v62 = vld [vmem:[#allocation3 + $0x238] sm:$0xff] }
 0x13f   : > { %2377 = vmatpush3.bf16.msra.mxu1 %v1138_v18 }
 0x140   : > { %2378 = vmatprep.subr.bf16.mxu1 %v1139_v3 }
 0x143   : > { %2379 = vmatpush3.bf16.msra.mxu1 %v1139_v3 }
 0x144   : > { %2380 = vmatprep.subr.bf16.mxu1 %v1140_v34 }
 0x145   : > { %2349 = vmatmul.mubr.bf16.gmra.mrb[88].mxu1 %v3348_v40  ;;  %1191 = vmatmul.mubr.bf16.gmra.mrb[88].mxu0 %v3105_v0 }
 0x146   : > { %2352 = vmatprep.mubr.bf16.mxu1 %v3351_v53  ;;  %1198 = vmatprep.mubr.bf16.mxu0 %v3200_v41 }
 0x147   : > { %2381 = vmatpush3.bf16.msra.mxu1 %v1140_v34 }
 0x148   : > { %2382 = vmatprep.subr.bf16.mxu1 %v1141_v37 }
 0x14b   : > { %2383 = vmatpush3.bf16.msra.mxu1 %v1141_v37 }
 0x14c   : > { %2384 = vmatprep.subr.bf16.mxu1 %v1142_v47 }
 0x14d   : > { %2353 = vmatmul.mubr.bf16.gmra.mrb[92].mxu1 %v3360_v31  ;;  %1199 = vmatmul.mubr.bf16.gmra.mrb[92].mxu0 %v3139_v27 }
 0x14e   : > { %2356 = vmatprep.mubr.bf16.mxu1 %v3363_v20  ;;  %1204 = vmatprep.mubr.bf16.mxu0 %v3221_v33 }
 0x14f   : > { %2385 = vmatpush3.bf16.msra.mxu1 %v1142_v47 }
 0x150   : > { %2386 = vmatprep.subr.bf16.mxu1 %v1143_v62 }
 0x153   : > { %2387 = vmatpush3.bf16.msra.mxu1 %v1143_v62 }
 0x155   : > { %2357 = vmatmul.mubr.bf16.gmra.mrb[0].mxu1 %v3375_v2  ;;  %1205 = vmatmul.mubr.bf16.gmra.mrb[96].mxu0 %v3174_v59 }
 0x156   : > { %2360 = vmatprep.mubr.bf16.mxu1 %v3033_v25  ;;  %1212 = vmatprep.mubr.bf16.mxu0 %v3230_v24 }
 0x15d   : > { %2361 = vmatmul.mubr.bf16.gmra.mrb[4].mxu1 %v3075_v49  ;;  %1213 = vmatmul.mubr.bf16.gmra.mrb[100].mxu0 %v3192_v29  ;;  %v422_v29 = vsel %vm372_vm0, %v3101_v63, %v373_v35 }
 0x15e   : > { %2364 = vmatprep.mubr.bf16.mxu1 %v3090_v56  ;;  %1218 = vmatprep.mubr.bf16.mxu0 %v3239_v22 }
 0x165   : > { %2365 = vmatmul.mubr.bf16.gmra.mrb[8].mxu1 %v3108_v1  ;;  %1219 = vmatmul.mubr.bf16.gmra.mrb[104].mxu0 %v3014_v13 }
 0x166   : > { %2368 = vmatprep.mubr.bf16.mxu1 %v3122_v14  ;;  %1226 = vmatprep.mubr.bf16.mxu0 %v3250_v50 }
 0x168   : > { %v1884_v0 = vpop.f32.mrb[0].mxu0 }
 0x169   : > { %v1885_v27 = vpop.f32.mrb[1].mxu0 }
 0x16a   : > { %v3410_v59 = vadd.f32 %v1885_v27, %v1884_v0  ;;  %v1887_v41 = vpop.f32.mrb[2].mxu0 }
 0x16b   : > { %v1888_v45 = vpop.f32.mrb[3].mxu0 }
 0x16c   : > { %v3416_v30 = vadd.f32 %v1888_v45, %v1887_v41 }
 0x16d   : > { %2369 = vmatmul.mubr.bf16.gmra.mrb[12].mxu1 %v422_v29  ;;  %1227 = vmatmul.mubr.bf16.gmra.mrb[108].mxu0 %v3020_v17 }
 0x16e   : > { %1232 = vmatprep.mubr.bf16.mxu0 %v3260_v10  ;;  %2388 = vmatprep.mubr.bf16.mxu1 %v3339_v48  ;;  %v3438_v48 = vld [vmem:[%s2926_s7 + $0x90] sm:$0xff] }
 0x16f   : > { %v458_v55 = vshll.u32 %v3438_v48, 16 }
 0x170   : > { %v1890_v13 = vpop.f32.mrb[4].mxu0 }
 0x171   : > { %v1891_v33 = vpop.f32.mrb[5].mxu0  ;;  %v460_v52 = vrot.slane %v458_v55, 1 }
 0x172   : > { %v1893_v24 = vpop.f32.mrb[6].mxu0 }
 0x173   : > { %v1894_v22 = vpop.f32.mrb[7].mxu0  ;;  %v480_v24 = vrot.slane %v3438_v48, 1 }
 0x175   : > { %1233 = vmatmul.mubr.bf16.gmra.mrb[112].mxu0 %v3055_v36  ;;  %2389 = vmatmul.mubr.bf16.vlgmr.msra.gmra.mrb[80].mxu1 %v3348_v40 }
 0x176   : > { %1240 = vmatprep.mubr.bf16.mxu0 %v3269_v6  ;;  %2392 = vmatprep.mubr.bf16.mxu1 %v3351_v53 }
 0x178   : > { %v1896_v63 = vpop.f32.mrb[8].mxu0 }
 0x179   : > { %v1897_v15 = vpop.f32.mrb[9].mxu0 }
 0x17a   : > { %v3425_v35 = vadd.f32 %v1897_v15, %v1896_v63  ;;  %v1899_v17 = vpop.f32.mrb[10].mxu0 }
 0x17b   : > { %v1900_v43 = vpop.f32.mrb[11].mxu0 }
 0x17c   : > { %v3427_v50 = vadd.f32 %v1900_v43, %v1899_v17 }
 0x17d   : > { %1241 = vmatmul.mubr.bf16.gmra.mrb[116].mxu0 %v3064_v42  ;;  %2393 = vmatmul.mubr.bf16.gmra.mrb[84].mxu1 %v3360_v31 }
 0x17e   : > { %1246 = vmatprep.mubr.bf16.mxu0 %v3278_v28  ;;  %2396 = vmatprep.mubr.bf16.mxu1 %v3363_v20 }
 0x180   : > { %v1902_v36 = vpop.f32.mrb[12].mxu0 }
 0x181   : > { %v1903_v10 = vpop.f32.mrb[13].mxu0 }
 0x182   : > { %v1905_v6 = vpop.f32.mrb[14].mxu0 }
 0x183   : > { %v1906_v8 = vpop.f32.mrb[15].mxu0 }
 0x184   : > { %v481_v8 = vsel %vm372_vm0, %v3136_v26, %v480_v24 }
 0x185   : > { %1247 = vmatmul.mubr.bf16.gmra.mrb[120].mxu0 %v3079_v51  ;;  %2397 = vmatmul.mubr.bf16.gmra.mrb[88].mxu1 %v3375_v2  ;;  %v3454_v2 = vld [vmem:[%s2926_s7 + $0x98] sm:$0xff]  ;;  %s1612_s7 = sshll.u32 %s2982_s20, 4  ;;  %s3561_s7 = int_to_ptr.vmem [resolvable:$true] %s1612_s7 }
 0x186   : > { %1254 = vmatprep.mubr.bf16.mxu0 %v3290_v11  ;;  %2400 = vmatprep.mubr.bf16.mxu1 %v3033_v25  ;;  %v482_v22 = vrot.slane %v3454_v2, 1  ;;  %s2688_s30 = scalar_lea.vmem %s3561_s7, 1024  ;;  %p2695_p13 = scmp.lt.s32.totalorder %s3561_s7, %s2693_s10 }
 0x187   : > { %p2689_p5 = scmp.ne.s32.totalorder %s3561_s7, %s2688_s30  ;;  %p2696_p1 = scmp.lt.s32.totalorder %s2694_s1, %s2688_s30 }
 0x188   : > { %v2020_v12 = vpop.f32.mrb[16].mxu1  ;;  %v1908_v42 = vpop.f32.mrb[16].mxu0  ;;  %v488_v55 = vsel %vm372_vm0, %v482_v22, %v3330_v21 }
 0x189   : > { %v2021_v40 = vpop.f32.mrb[17].mxu1  ;;  %v1909_v28 = vpop.f32.mrb[17].mxu0  ;;  %p2690_p11 = pnand %p2689_p5, %p3673_p9  ;;  %p2697_p2 = por %p2696_p1, %p2695_p13 }
 0x18a   : > { %v3440_v53 = vadd.f32 %v2021_v40, %v2020_v12  ;;  %v2023_v9 = vpop.f32.mrb[18].mxu1  ;;  %v3442_v31 = vadd.f32 %v1909_v28, %v1908_v42  ;;  %v1911_v19 = vpop.f32.mrb[18].mxu0 }
 0x18b   : > { %v2024_v51 = vpop.f32.mrb[19].mxu1  ;;  %v1912_v20 = vpop.f32.mrb[19].mxu0  ;;  %p2691_p12 = pneg %p2690_p11 }
 0x18c   : > { %v3445_v11 = vadd.f32 %v2024_v51, %v2023_v9  ;;  %v3447_v25 = vadd.f32 %v1912_v20, %v1911_v19 }
 0x18d   : > { %1255 = vmatmul.mubr.bf16.gmra.mrb[124].mxu0 %v3093_v57  ;;  %2401 = vmatmul.mubr.bf16.gmra.mrb[92].mxu1 %v3075_v49  ;;  %v461_v57 = vsel %vm208_vm1, %v3306_v60, %v460_v52  ;;  %v462_v49 = vshrl.u32 %v3438_v48, 16  ;;  %p2698_p4 = pnand %p2697_p2, %p2691_p12 }
 0x18e   : > { %1260 = vmatprep.mubr.bf16.mxu0 %v3299_v54  ;;  %2404 = vmatprep.mubr.bf16.mxu1 %v3090_v56  ;;  %v466_v54 = vshll.u32 %v3454_v2, 16 }
 0x18f   : > { %v464_v56 = vor.u32 %v462_v49, %v460_v52 }
 0x190   : > { %v2026_v39 = vpop.f32.mrb[20].mxu1  ;;  %v1914_v58 = vpop.f32.mrb[20].mxu0  ;;  %v468_v34 = vrot.slane %v466_v54, 1 }
 0x191   : > { %v2027_v38 = vpop.f32.mrb[21].mxu1  ;;  %v1915_v44 = vpop.f32.mrb[21].mxu0 }
 0x192   : > { %v2029_v23 = vpop.f32.mrb[22].mxu1  ;;  %v1917_v16 = vpop.f32.mrb[22].mxu0 }
 0x193   : > { %v2030_v18 = vpop.f32.mrb[23].mxu1  ;;  %v1918_v3 = vpop.f32.mrb[23].mxu0 }
 0x195   : > { %1261 = vmatmul.mubr.bf16.gmra.mrb[128].mxu0 %v3115_v5  ;;  %2405 = vmatmul.mubr.bf16.gmra.mrb[0].mxu1 %v3108_v1  ;;  %v469_v5 = vsel %vm208_vm1, %v464_v56, %v468_v34  ;;  %v470_v1 = vshrl.u32 %v3454_v2, 16 }
 0x196   : > { %1268 = vmatprep.mubr.bf16.mxu0 %v461_v57  ;;  %2408 = vmatprep.mubr.bf16.mxu1 %v3122_v14 }
 0x197   : > { %v472_v63 = vor.u32 %v470_v1, %v468_v34 }
 0x198   : > { %v2032_v37 = vpop.f32.mrb[24].mxu1  ;;  %v1920_v47 = vpop.f32.mrb[24].mxu0 }
 0x199   : > { %v2033_v62 = vpop.f32.mrb[25].mxu1  ;;  %v1921_v0 = vpop.f32.mrb[25].mxu0 }
 0x19a   : > { %v3463_v27 = vadd.f32 %v2033_v62, %v2032_v37  ;;  %v2035_v60 = vpop.f32.mrb[26].mxu1  ;;  %v3465_v41 = vadd.f32 %v1921_v0, %v1920_v47  ;;  %v1923_v29 = vpop.f32.mrb[26].mxu0 }
 0x19b   : > { %v2036_v45 = vpop.f32.mrb[27].mxu1  ;;  %v1924_v13 = vpop.f32.mrb[27].mxu0 }
 0x19c   : > { %v3469_v33 = vadd.f32 %v2036_v45, %v2035_v60  ;;  %v3471_v14 = vadd.f32 %v1924_v13, %v1923_v29 }
 0x19d   : > { %1269 = vmatmul.mubr.bf16.gmra.mrb[132].mxu0 %v3127_v4  ;;  %2409 = vmatmul.mubr.bf16.gmra.mrb[4].mxu1 %v3149_v32  ;;  %v483_v32 = vsel %vm372_vm0, %v480_v24, %v482_v22 }
 0x19e   : > { %1274 = vmatprep.mubr.bf16.mxu0 %v469_v5  ;;  %2412 = vmatprep.mubr.bf16.mxu1 %v3158_v7  ;;  %v477_v7 = vsel %vm3309_vm3, %v472_v63, %v3067_v46 }
 0x1a0   : > { %v2038_v15 = vpop.f32.mrb[28].mxu1  ;;  %v1926_v17 = vpop.f32.mrb[28].mxu0 }
 0x1a1   : > { %v2039_v43 = vpop.f32.mrb[29].mxu1  ;;  %v1927_v36 = vpop.f32.mrb[29].mxu0 }
 0x1a2   : > { %v2041_v10 = vpop.f32.mrb[30].mxu1  ;;  %v1929_v6 = vpop.f32.mrb[30].mxu0 }
 0x1a3   : > { %v2042_v4 = vpop.f32.mrb[31].mxu1  ;;  %v1930_v12 = vpop.f32.mrb[31].mxu0 }
 0x1a5   : > { %1275 = vmatmul.mubr.bf16.gmra.mrb[136].mxu0 %v3438_v48  ;;  %2413 = vmatmul.mubr.bf16.gmra.mrb[8].mxu1 %v481_v8 }
 0x1a6   : > { %2416 = vmatprep.mubr.bf16.mxu1 %v483_v32  ;;  %1282 = vmatprep.mubr.bf16.mxu0 %v477_v7 }
 0x1a8   : > { %v2044_v42 = vpop.f32.mrb[32].mxu1  ;;  %v1932_v40 = vpop.f32.mrb[32].mxu0 }
 0x1a9   : > { %v2045_v28 = vpop.f32.mrb[33].mxu1  ;;  %v1933_v9 = vpop.f32.mrb[33].mxu0 }
 0x1aa   : > { %v3485_v19 = vadd.f32 %v2045_v28, %v2044_v42  ;;  %v2047_v26 = vpop.f32.mrb[34].mxu1  ;;  %v1934_v51 = vadd.f32 %v1933_v9, %v1932_v40  ;;  %v1935_v20 = vpop.f32.mrb[34].mxu0 }
 0x1ab   : > { %v2048_v52 = vpop.f32.mrb[35].mxu1  ;;  %v1936_v61 = vpop.f32.mrb[35].mxu0 }
 0x1ac   : > { %v3489_v46 = vadd.f32 %v2048_v52, %v2047_v26  ;;  %v1937_v48 = vadd.f32 %v1936_v61, %v1935_v20 }
 0x1ad   : > { %2417 = vmatmul.mubr.bf16.gmra.mrb[12].mxu1 %v488_v55  ;;  %1283 = vmatmul.mubr.bf16.gmra.mrb[140].mxu0 %v3454_v2 }
 0x1b0   : > { %v2050_v39 = vpop.f32.mrb[36].mxu1  ;;  %v1938_v58 = vpop.f32.mrb[36].mxu0 }
 0x1b1   : > { %v2051_v38 = vpop.f32.mrb[37].mxu1  ;;  %v1939_v44 = vpop.f32.mrb[37].mxu0 }
 0x1b2   : > { %v2053_v23 = vpop.f32.mrb[38].mxu1  ;;  %v1941_v16 = vpop.f32.mrb[38].mxu0 }
 0x1b3   : > { %v2054_v18 = vpop.f32.mrb[39].mxu1  ;;  %v1942_v3 = vpop.f32.mrb[39].mxu0 }
 0x1b8   : > { %v2056_v57 = vpop.f32.mrb[40].mxu1  ;;  %v1944_v49 = vpop.f32.mrb[40].mxu0 }
 0x1b9   : > { %v2057_v54 = vpop.f32.mrb[41].mxu1  ;;  %v1945_v21 = vpop.f32.mrb[41].mxu0 }
 0x1ba   : > { %v3492_v56 = vadd.f32 %v2057_v54, %v2056_v57  ;;  %v2059_v34 = vpop.f32.mrb[42].mxu1  ;;  %v1946_v37 = vadd.f32 %v1945_v21, %v1944_v49  ;;  %v1947_v47 = vpop.f32.mrb[42].mxu0 }
 0x1bb   : > { %v2060_v62 = vpop.f32.mrb[43].mxu1  ;;  %v1948_v0 = vpop.f32.mrb[43].mxu0 }
 0x1bc   : > { %v3494_v2 = vadd.f32 %v2060_v62, %v2059_v34  ;;  %v1949_v60 = vadd.f32 %v1948_v0, %v1947_v47 }
 0x1c0   : > { %v2062_v29 = vpop.f32.mrb[44].mxu1  ;;  %v1950_v45 = vpop.f32.mrb[44].mxu0 }
 0x1c1   : > { %v2063_v13 = vpop.f32.mrb[45].mxu1  ;;  %v1951_v5 = vpop.f32.mrb[45].mxu0 }
 0x1c2   : > { %v2065_v1 = vpop.f32.mrb[46].mxu1  ;;  %v1953_v24 = vpop.f32.mrb[46].mxu0 }
 0x1c3   : > { %v2066_v22 = vpop.f32.mrb[47].mxu1  ;;  %v1954_v63 = vpop.f32.mrb[47].mxu0 }
 0x1c8   : > { %v2068_v15 = vpop.f32.mrb[48].mxu1  ;;  %v1956_v17 = vpop.f32.mrb[48].mxu0 }
 0x1c9   : > { %v2069_v43 = vpop.f32.mrb[49].mxu1  ;;  %v1957_v36 = vpop.f32.mrb[49].mxu0 }
 0x1ca   : > { %v2070_v10 = vadd.f32 %v2069_v43, %v2068_v15  ;;  %v2071_v6 = vpop.f32.mrb[50].mxu1  ;;  %v1958_v8 = vadd.f32 %v1957_v36, %v1956_v17  ;;  %v1959_v4 = vpop.f32.mrb[50].mxu0 }
 0x1cb   : > { %v2072_v12 = vpop.f32.mrb[51].mxu1  ;;  %v1960_v32 = vpop.f32.mrb[51].mxu0 }
 0x1cc   : > { %v3496_v7 = vadd.f32 %v2070_v10, %v1934_v51  ;;  %v2073_v42 = vadd.f32 %v2072_v12, %v2071_v6  ;;  %v1961_v40 = vadd.f32 %v1960_v32, %v1959_v4 }
 0x1ce   : > { %v3498_v28 = vadd.f32 %v2073_v42, %v1937_v48 }
 0x1d0   : > { %v2074_v9 = vpop.f32.mrb[52].mxu1  ;;  %v1962_v26 = vpop.f32.mrb[52].mxu0 }
 0x1d1   : > { %v2075_v20 = vpop.f32.mrb[53].mxu1  ;;  %v1963_v55 = vpop.f32.mrb[53].mxu0 }
 0x1d2   : > { %v2077_v52 = vpop.f32.mrb[54].mxu1  ;;  %v1965_v61 = vpop.f32.mrb[54].mxu0 }
 0x1d3   : > { %v2078_v39 = vpop.f32.mrb[55].mxu1  ;;  %v1966_v58 = vpop.f32.mrb[55].mxu0 }
 0x1d8   : > { %v2080_v38 = vpop.f32.mrb[56].mxu1  ;;  %v1968_v44 = vpop.f32.mrb[56].mxu0 }
 0x1d9   : > { %v2081_v23 = vpop.f32.mrb[57].mxu1  ;;  %v1969_v16 = vpop.f32.mrb[57].mxu0 }
 0x1da   : > { %v2082_v18 = vadd.f32 %v2081_v23, %v2080_v38  ;;  %v2083_v3 = vpop.f32.mrb[58].mxu1  ;;  %v1970_v51 = vadd.f32 %v1969_v16, %v1968_v44  ;;  %v1971_v57 = vpop.f32.mrb[58].mxu0 }
 0x1db   : > { %v2084_v49 = vpop.f32.mrb[59].mxu1  ;;  %v1972_v54 = vpop.f32.mrb[59].mxu0 }
 0x1dc   : > { %v3500_v48 = vadd.f32 %v2082_v18, %v1946_v37  ;;  %v2085_v21 = vadd.f32 %v2084_v49, %v2083_v3  ;;  %v1973_v34 = vadd.f32 %v1972_v54, %v1971_v57 }
 0x1de   : > { %v3502_v47 = vadd.f32 %v2085_v21, %v1949_v60 }
 0x1e0   : > { %v2086_v62 = vpop.f32.mrb[60].mxu1  ;;  %v1974_v0 = vpop.f32.mrb[60].mxu0 }
 0x1e1   : > { %v2087_v29 = vpop.f32.mrb[61].mxu1  ;;  %v1975_v45 = vpop.f32.mrb[61].mxu0 }
 0x1e2   : > { %v2089_v13 = vpop.f32.mrb[62].mxu1  ;;  %v1977_v5 = vpop.f32.mrb[62].mxu0 }
 0x1e3   : > { %v2090_v1 = vpop.f32.mrb[63].mxu1  ;;  %v1978_v24 = vpop.f32.mrb[63].mxu0 }
 0x1e8   : > { %v2294_v22 = vpop.f32.mrb[64].mxu0  ;;  %v2092_v63 = vpop.f32.mrb[64].mxu1 }
 0x1e9   : > { %v718_v15 = vpop.f32.mrb[65].mxu0  ;;  %v2093_v17 = vpop.f32.mrb[65].mxu1 }
 0x1ea   : > { %v719_v43 = vadd.f32 %v3410_v59, %v718_v15  ;;  %v2094_v37 = vadd.f32 %v2093_v17, %v2092_v63  ;;  %v2295_v36 = vpop.f32.mrb[66].mxu0  ;;  %v2095_v10 = vpop.f32.mrb[66].mxu1 }
 0x1eb   : > { %v721_v6 = vpop.f32.mrb[67].mxu0  ;;  %v2096_v60 = vpop.f32.mrb[67].mxu1 }
 0x1ec   : > { %v864_v4 = vadd.f32 %v3440_v53, %v719_v43  ;;  %v3506_v12 = vadd.f32 %v2094_v37, %v1958_v8  ;;  %v722_v32 = vadd.f32 %v3416_v30, %v721_v6  ;;  %v2097_v42 = vadd.f32 %v2096_v60, %v2095_v10 }
 0x1ee   : > { %v867_v9 = vadd.f32 %v3445_v11, %v722_v32  ;;  %v3510_v26 = vadd.f32 %v2097_v42, %v1961_v40 }
 0x1f0   : > { %v2298_v20 = vpop.f32.mrb[68].mxu0  ;;  %v2098_v55 = vpop.f32.mrb[68].mxu1 }
 0x1f1   : > { %v732_v52 = vpop.f32.mrb[69].mxu0  ;;  %v2099_v59 = vpop.f32.mrb[69].mxu1 }
 0x1f2   : > { %v733_v61 = vadd.f32 %v3425_v35, %v732_v52  ;;  %v2299_v39 = vpop.f32.mrb[70].mxu0  ;;  %v2101_v58 = vpop.f32.mrb[70].mxu1 }
 0x1f3   : > { %v735_v38 = vpop.f32.mrb[71].mxu0  ;;  %v2102_v44 = vpop.f32.mrb[71].mxu1 }
 0x1f4   : > { %v878_v53 = vadd.f32 %v3463_v27, %v733_v61  ;;  %v736_v8 = vadd.f32 %v3427_v50, %v735_v38 }
 0x1f6   : > { %v881_v30 = vadd.f32 %v3469_v33, %v736_v8 }
 0x1f8   : > { %v2302_v23 = vpop.f32.mrb[72].mxu0  ;;  %v2104_v11 = vpop.f32.mrb[72].mxu1 }
 0x1f9   : > { %v746_v40 = vpop.f32.mrb[73].mxu0  ;;  %v2105_v16 = vpop.f32.mrb[73].mxu1 }
 0x1fa   : > { %v747_v18 = vadd.f32 %v3442_v31, %v746_v40  ;;  %v2106_v3 = vadd.f32 %v2105_v16, %v2104_v11  ;;  %v2303_v57 = vpop.f32.mrb[74].mxu0  ;;  %v2107_v49 = vpop.f32.mrb[74].mxu1 }
 0x1fb   : > { %v749_v35 = vpop.f32.mrb[75].mxu0  ;;  %v2108_v54 = vpop.f32.mrb[75].mxu1 }
 0x1fc   : > { %v892_v21 = vadd.f32 %v3485_v19, %v747_v18  ;;  %v3518_v62 = vadd.f32 %v2106_v3, %v1970_v51  ;;  %v750_v27 = vadd.f32 %v3447_v25, %v749_v35  ;;  %v2109_v50 = vadd.f32 %v2108_v54, %v2107_v49 }
 0x1fe   : > { %v895_v33 = vadd.f32 %v3489_v46, %v750_v27  ;;  %v3522_v0 = vadd.f32 %v2109_v50, %v1973_v34 }
 0x200   : > { %v2306_v29 = vpop.f32.mrb[76].mxu0  ;;  %v2110_v45 = vpop.f32.mrb[76].mxu1 }
 0x201   : > { %v760_v13 = vpop.f32.mrb[77].mxu0  ;;  %v2111_v31 = vpop.f32.mrb[77].mxu1 }
 0x202   : > { %v761_v5 = vadd.f32 %v3465_v41, %v760_v13  ;;  %v2307_v1 = vpop.f32.mrb[78].mxu0  ;;  %v2113_v24 = vpop.f32.mrb[78].mxu1 }
 0x203   : > { %v763_v22 = vpop.f32.mrb[79].mxu0  ;;  %v2114_v63 = vpop.f32.mrb[79].mxu1 }
 0x204   : > { %v906_v19 = vadd.f32 %v3492_v56, %v761_v5  ;;  %v764_v51 = vadd.f32 %v3471_v14, %v763_v22 }
 0x206   : > { %v909_v25 = vadd.f32 %v3494_v2, %v764_v51 }
 0x208   : > { %v2156_v15 = vpop.f32.mrb[80].mxu0 }
 0x209   : > { %v2157_v46 = vpop.f32.mrb[81].mxu0 }
 0x20a   : > { %v2158_v34 = vadd.f32 %v2157_v46, %v2156_v15  ;;  %v2159_v17 = vpop.f32.mrb[82].mxu0 }
 0x20b   : > { %v2160_v43 = vpop.f32.mrb[83].mxu0 }
 0x20c   : > { %v2161_v37 = vadd.f32 %v2160_v43, %v2159_v17  ;;  %v2438_v36 = vadd.f32 %v2158_v34, %v864_v4 }
 0x20e   : > { %v2442_v10 = vadd.f32 %v2161_v37, %v867_v9 }
 0x210   : > { %v2162_v6 = vpop.f32.mrb[84].mxu0 }
 0x211   : > { %v2163_v41 = vpop.f32.mrb[85].mxu0 }
 0x212   : > { %v2165_v60 = vpop.f32.mrb[86].mxu0 }
 0x213   : > { %v2166_v32 = vpop.f32.mrb[87].mxu0 }
 0x218   : > { %v2168_v42 = vpop.f32.mrb[88].mxu0 }
 0x219   : > { %v2169_v20 = vpop.f32.mrb[89].mxu0 }
 0x21a   : > { %v2170_v55 = vadd.f32 %v2169_v20, %v2168_v42  ;;  %v2171_v56 = vpop.f32.mrb[90].mxu0 }
 0x21b   : > { %v2172_v52 = vpop.f32.mrb[91].mxu0 }
 0x21c   : > { %v2173_v14 = vadd.f32 %v2172_v52, %v2171_v56  ;;  %v2446_v59 = vadd.f32 %v2170_v55, %v878_v53 }
 0x21e   : > { %v2450_v2 = vadd.f32 %v2173_v14, %v881_v30 }
 0x220   : > { %v2174_v61 = vpop.f32.mrb[92].mxu0 }
 0x221   : > { %v2175_v39 = vpop.f32.mrb[93].mxu0 }
 0x222   : > { %v2177_v58 = vpop.f32.mrb[94].mxu0 }
 0x223   : > { %v2178_v38 = vpop.f32.mrb[95].mxu0 }
 0x228   : > { %v2180_v44 = vpop.f32.mrb[96].mxu0 }
 0x229   : > { %v2181_v8 = vpop.f32.mrb[97].mxu0 }
 0x22a   : > { %v2182_v4 = vadd.f32 %v2181_v8, %v2180_v44  ;;  %v2183_v9 = vpop.f32.mrb[98].mxu0 }
 0x22b   : > { %v2184_v23 = vpop.f32.mrb[99].mxu0 }
 0x22c   : > { %v2185_v11 = vadd.f32 %v2184_v23, %v2183_v9  ;;  %v2454_v40 = vadd.f32 %v2182_v4, %v892_v21 }
 0x22e   : > { %v3528_v16 = vadd.f32 %v2185_v11, %v895_v33 }
 0x230   : > { %v2186_v18 = vpop.f32.mrb[100].mxu0 }
 0x231   : > { %v2187_v3 = vpop.f32.mrb[101].mxu0 }
 0x232   : > { %v2189_v57 = vpop.f32.mrb[102].mxu0 }
 0x233   : > { %v2190_v49 = vpop.f32.mrb[103].mxu0 }
 0x238   : > { %v2192_v35 = vpop.f32.mrb[104].mxu0 }
 0x239   : > { %v2193_v53 = vpop.f32.mrb[105].mxu0 }
 0x23a   : > { %v2194_v30 = vadd.f32 %v2193_v53, %v2192_v35  ;;  %v2195_v54 = vpop.f32.mrb[106].mxu0 }
 0x23b   : > { %v2196_v27 = vpop.f32.mrb[107].mxu0 }
 0x23c   : > { %v2197_v50 = vadd.f32 %v2196_v27, %v2195_v54  ;;  %v3530_v29 = vadd.f32 %v2194_v30, %v906_v19 }
 0x23e   : > { %v3532_v45 = vadd.f32 %v2197_v50, %v909_v25 }
 0x240   : > { %v2198_v13 = vpop.f32.mrb[108].mxu0 }
 0x241   : > { %v2199_v31 = vpop.f32.mrb[109].mxu0 }
 0x242   : > { %v2201_v5 = vpop.f32.mrb[110].mxu0 }
 0x243   : > { %v2202_v21 = vpop.f32.mrb[111].mxu0 }
 0x248   : > { %v2204_v33 = vpop.f32.mrb[112].mxu0  ;;  %v2390_v1 = vpop.f32.mrb[80].mxu1 }
 0x249   : > { %v2205_v24 = vpop.f32.mrb[113].mxu0  ;;  %v1323_v22 = vpop.f32.mrb[81].mxu1 }
 0x24a   : > { %v2206_v63 = vadd.f32 %v2205_v24, %v2204_v33  ;;  %v2439_v51 = vadd.f32 %v2438_v36, %v1323_v22  ;;  %v2207_v15 = vpop.f32.mrb[114].mxu0  ;;  %v2391_v46 = vpop.f32.mrb[82].mxu1 }
 0x24b   : > { %v2208_v34 = vpop.f32.mrb[115].mxu0  ;;  %v1326_v17 = vpop.f32.mrb[83].mxu1 }
 0x24c   : > { %v2209_v43 = vadd.f32 %v2208_v34, %v2207_v15  ;;  %v2443_v19 = vadd.f32 %v2442_v10, %v1326_v17  ;;  %v3535_v25 = vadd.f32 %v3496_v7, %v2206_v63  ;;  %v1551_v37 = vmul.f32 %v2439_v51, %v2439_v51 }
 0x24e   : > { %v1824_v6 = vpack.c.bf16 %v2443_v19, %v2439_v51  ;;  %v1530_v41 = vadd.f32 %v2443_v19, %v2439_v51  ;;  %v1552_v60 = vmul.f32 %v2443_v19, %v2443_v19  ;;  %v3538_v32 = vadd.f32 %v3498_v28, %v2209_v43 }
 0x250   : > { %1825 = vst [vmem:[%s2982_s20] sm:$0xff] %v1824_v6   ;;  %v1567_v42 = vadd.f32 %v1552_v60, %v1551_v37  ;;  %v2394_v20 = vpop.f32.mrb[84].mxu1  ;;  %v2210_v36 = vpop.f32.mrb[116].mxu0 }
 0x251   : > { %v1337_v55 = vpop.f32.mrb[85].mxu1  ;;  %v2211_v56 = vpop.f32.mrb[117].mxu0 }
 0x252   : > { %v2447_v52 = vadd.f32 %v2446_v59, %v1337_v55  ;;  %v2395_v14 = vpop.f32.mrb[86].mxu1  ;;  %v2213_v10 = vpop.f32.mrb[118].mxu0 }
 0x253   : > { %v1340_v61 = vpop.f32.mrb[87].mxu1  ;;  %v2214_v7 = vpop.f32.mrb[119].mxu0 }
 0x254   : > { %v1531_v39 = vadd.f32 %v2447_v52, %v1530_v41  ;;  %v1553_v58 = vmul.f32 %v2447_v52, %v2447_v52  ;;  %v2451_v38 = vadd.f32 %v2450_v2, %v1340_v61 }
 0x256   : > { %v1568_v44 = vadd.f32 %v1567_v42, %v1553_v58  ;;  %v1829_v8 = vpack.c.bf16 %v2451_v38, %v2447_v52  ;;  %v1532_v4 = vadd.f32 %v2451_v38, %v1531_v39  ;;  %v1554_v28 = vmul.f32 %v2451_v38, %v2451_v38 }
 0x258   : > { %1861 = vst [vmem:[%s2982_s20 + $0x8] sm:$0xff] %v1829_v8   ;;  %v1569_v9 = vadd.f32 %v1568_v44, %v1554_v28  ;;  %v2216_v23 = vpop.f32.mrb[120].mxu0  ;;  %v2398_v11 = vpop.f32.mrb[88].mxu1 }
 0x259   : > { %v2217_v18 = vpop.f32.mrb[121].mxu0  ;;  %v1351_v3 = vpop.f32.mrb[89].mxu1 }
 0x25a   : > { %v2218_v57 = vadd.f32 %v2217_v18, %v2216_v23  ;;  %v2455_v59 = vadd.f32 %v2454_v40, %v1351_v3  ;;  %v2219_v49 = vpop.f32.mrb[122].mxu0  ;;  %v2399_v35 = vpop.f32.mrb[90].mxu1 }
 0x25b   : > { %v2220_v53 = vpop.f32.mrb[123].mxu0  ;;  %v1354_v30 = vpop.f32.mrb[91].mxu1 }
 0x25c   : > { %v1533_v54 = vadd.f32 %v2455_v59, %v1532_v4  ;;  %v1555_v27 = vmul.f32 %v2455_v59, %v2455_v59  ;;  %v2221_v2 = vadd.f32 %v2220_v53, %v2219_v49  ;;  %v2459_v50 = vadd.f32 %v3528_v16, %v1354_v30 }
 0x25d   : > { %v2475_v13 = vadd.f32 %v3500_v48, %v2218_v57 }
 0x25e   : > { %v1570_v31 = vadd.f32 %v1569_v9, %v1555_v27  ;;  %v1834_v5 = vpack.c.bf16 %v2459_v50, %v2455_v59  ;;  %v1534_v21 = vadd.f32 %v2459_v50, %v1533_v54  ;;  %v1556_v33 = vmul.f32 %v2459_v50, %v2459_v50 }
 0x25f   : > { %v2478_v1 = vadd.f32 %v3502_v47, %v2221_v2 }
 0x260   : > { %1862 = vst [vmem:[%s2982_s20 + $0x10] sm:$0xff] %v1834_v5   ;;  %v1571_v24 = vadd.f32 %v1570_v31, %v1556_v33  ;;  %v2402_v40 = vpop.f32.mrb[92].mxu1  ;;  %v2222_v22 = vpop.f32.mrb[124].mxu0 }
 0x261   : > { %v1365_v63 = vpop.f32.mrb[93].mxu1  ;;  %v2223_v51 = vpop.f32.mrb[125].mxu0 }
 0x262   : > { %v2463_v15 = vadd.f32 %v3530_v29, %v1365_v63  ;;  %v2403_v46 = vpop.f32.mrb[94].mxu1  ;;  %v2225_v34 = vpop.f32.mrb[126].mxu0 }
 0x263   : > { %v1368_v16 = vpop.f32.mrb[95].mxu1  ;;  %v2226_v17 = vpop.f32.mrb[127].mxu0 }
 0x264   : > { %v1535_v48 = vadd.f32 %v2463_v15, %v1534_v21  ;;  %v1557_v43 = vmul.f32 %v2463_v15, %v2463_v15  ;;  %v2467_v19 = vadd.f32 %v3532_v45, %v1368_v16 }
 0x266   : > { %v1572_v37 = vadd.f32 %v1571_v24, %v1557_v43  ;;  %v1839_v6 = vpack.c.bf16 %v2467_v19, %v2463_v15  ;;  %v1536_v47 = vadd.f32 %v2467_v19, %v1535_v48  ;;  %v1558_v41 = vmul.f32 %v2467_v19, %v2467_v19 }
 0x268   : > { %1863 = vst [vmem:[%s2982_s20 + $0x18] sm:$0xff] %v1839_v6   ;;  %v1573_v60 = vadd.f32 %v1572_v37, %v1558_v41  ;;  %v2228_v42 = vpop.f32.mrb[128].mxu0  ;;  %v2406_v20 = vpop.f32.mrb[0].mxu1 }
 0x269   : > { %v2229_v36 = vpop.f32.mrb[129].mxu0  ;;  %v1379_v55 = vpop.f32.mrb[1].mxu1 }
 0x26a   : > { %v2230_v56 = vadd.f32 %v2229_v36, %v2228_v42  ;;  %v2470_v29 = vadd.f32 %v3535_v25, %v1379_v55  ;;  %v2231_v52 = vpop.f32.mrb[130].mxu0  ;;  %v2407_v14 = vpop.f32.mrb[2].mxu1 }
 0x26b   : > { %v2232_v10 = vpop.f32.mrb[131].mxu0  ;;  %v1382_v61 = vpop.f32.mrb[3].mxu1 }
 0x26c   : > { %v1537_v7 = vadd.f32 %v2470_v29, %v1536_v47  ;;  %v1559_v45 = vmul.f32 %v2470_v29, %v2470_v29  ;;  %v2233_v39 = vadd.f32 %v2232_v10, %v2231_v52  ;;  %v2473_v58 = vadd.f32 %v3538_v32, %v1382_v61 }
 0x26d   : > { %v2481_v38 = vadd.f32 %v3506_v12, %v2230_v56 }
 0x26e   : > { %v1574_v44 = vadd.f32 %v1573_v60, %v1559_v45  ;;  %v1844_v8 = vpack.c.bf16 %v2473_v58, %v2470_v29  ;;  %v1538_v4 = vadd.f32 %v2473_v58, %v1537_v7  ;;  %v1560_v28 = vmul.f32 %v2473_v58, %v2473_v58 }
 0x26f   : > { %v2484_v9 = vadd.f32 %v3510_v26, %v2233_v39 }
 0x270   : > { %1864 = vst [vmem:[%s2982_s20 + $0x20] sm:$0xff] %v1844_v8   ;;  %v1575_v23 = vadd.f32 %v1574_v44, %v1560_v28  ;;  %v2410_v25 = vpop.f32.mrb[4].mxu1  ;;  %v2234_v11 = vpop.f32.mrb[132].mxu0 }
 0x271   : > { %v1393_v18 = vpop.f32.mrb[5].mxu1  ;;  %v2235_v3 = vpop.f32.mrb[133].mxu0 }
 0x272   : > { %v2476_v57 = vadd.f32 %v2475_v13, %v1393_v18  ;;  %v2411_v59 = vpop.f32.mrb[6].mxu1  ;;  %v2237_v49 = vpop.f32.mrb[134].mxu0 }
 0x273   : > { %v1396_v35 = vpop.f32.mrb[7].mxu1  ;;  %v2238_v32 = vpop.f32.mrb[135].mxu0 }
 0x274   : > { %v1539_v53 = vadd.f32 %v2476_v57, %v1538_v4  ;;  %v1561_v12 = vmul.f32 %v2476_v57, %v2476_v57  ;;  %v2479_v30 = vadd.f32 %v2478_v1, %v1396_v35 }
 0x276   : > { %v1576_v54 = vadd.f32 %v1575_v23, %v1561_v12  ;;  %v1849_v27 = vpack.c.bf16 %v2479_v30, %v2476_v57  ;;  %v1540_v2 = vadd.f32 %v2479_v30, %v1539_v53  ;;  %v1562_v50 = vmul.f32 %v2479_v30, %v2479_v30 }
 0x278   : > { %1865 = vst [vmem:[%s2982_s20 + $0x28] sm:$0xff] %v1849_v27   ;;  %v1577_v26 = vadd.f32 %v1576_v54, %v1562_v50  ;;  %v2240_v31 = vpop.f32.mrb[136].mxu0  ;;  %v2414_v5 = vpop.f32.mrb[8].mxu1 }
 0x279   : > { %v2241_v21 = vpop.f32.mrb[137].mxu0  ;;  %v1407_v33 = vpop.f32.mrb[9].mxu1 }
 0x27a   : > { %v2242_v13 = vadd.f32 %v2241_v21, %v2240_v31  ;;  %v2482_v24 = vadd.f32 %v2481_v38, %v1407_v33  ;;  %v2243_v40 = vpop.f32.mrb[138].mxu0  ;;  %v2415_v22 = vpop.f32.mrb[10].mxu1 }
 0x27b   : > { %v2244_v63 = vpop.f32.mrb[139].mxu0  ;;  %v1410_v51 = vpop.f32.mrb[11].mxu1 }
 0x27c   : > { %v1541_v1 = vadd.f32 %v2482_v24, %v1540_v2  ;;  %v1563_v15 = vmul.f32 %v2482_v24, %v2482_v24  ;;  %v2245_v46 = vadd.f32 %v2244_v63, %v2243_v40  ;;  %v2485_v34 = vadd.f32 %v2484_v9, %v1410_v51 }
 0x27d   : > { %v2487_v16 = vadd.f32 %v3518_v62, %v2242_v13 }
 0x27e   : > { %v1578_v17 = vadd.f32 %v1577_v26, %v1563_v15  ;;  %v1854_v48 = vpack.c.bf16 %v2485_v34, %v2482_v24  ;;  %v1542_v43 = vadd.f32 %v2485_v34, %v1541_v1  ;;  %v1564_v19 = vmul.f32 %v2485_v34, %v2485_v34 }
 0x27f   : > { %v2490_v37 = vadd.f32 %v3522_v0, %v2245_v46 }
 0x280   : > { %1866 = vst [vmem:[%s2982_s20 + $0x30] sm:$0xff] %v1854_v48   ;;  %v1579_v6 = vadd.f32 %v1578_v17, %v1564_v19  ;;  %v2418_v47 = vpop.f32.mrb[12].mxu1  ;;  %v2246_v41 = vpop.f32.mrb[140].mxu0 }
 0x281   : > { %v1421_v60 = vpop.f32.mrb[13].mxu1  ;;  %v2247_v42 = vpop.f32.mrb[141].mxu0 }
 0x282   : > { %v2488_v20 = vadd.f32 %v2487_v16, %v1421_v60  ;;  %v2419_v36 = vpop.f32.mrb[14].mxu1  ;;  %v2249_v62 = vpop.f32.mrb[142].mxu0 }
 0x283   : > { %v1424_v55 = vpop.f32.mrb[15].mxu1  ;;  %v2250_v56 = vpop.f32.mrb[143].mxu0 }
 0x284   : > { %v1543_v29 = vadd.f32 %v2488_v20, %v1542_v43  ;;  %v1565_v52 = vmul.f32 %v2488_v20, %v2488_v20  ;;  %v2491_v0 = vadd.f32 %v2490_v37, %v1424_v55 }
 0x286   : > { %v1580_v14 = vadd.f32 %v1579_v6, %v1565_v52  ;;  %v1859_v10 = vpack.c.bf16 %v2491_v0, %v2488_v20  ;;  %v1544_v61 = vadd.f32 %v2491_v0, %v1543_v29  ;;  %v1566_v7 = vmul.f32 %v2491_v0, %v2491_v0 }
 0x288   : > { %1867 = vst [vmem:[%s2982_s20 + $0x38] sm:$0xff] %v1859_v10   ;;  %v1545_v45 = vrot.slane %v1544_v61, 4  ;;  %v1581_v39 = vadd.f32 %v1580_v14, %v1566_v7 }
 0x289   : > { %2701 = shalt.err (!%p2698_p4)
}
 0x28a   : > { %s2702_s5 = scalar_lea.hbm %s3566_s21, 1024  ;;  %s2706_s18 = scalar_lea.hbm %s3647_s2, 4096 }
 0x28b   : > { %p2703_p0 = scmp.ne.s32.totalorder %s3566_s21, %s2702_s5  ;;  %p2707_p7 = scmp.lt.u32.totalorder %s3566_s21, %s3647_s2 }
 0x28c   : > { %p2708_p10 = scmp.lt.u32.totalorder %s2706_s18, %s2702_s5  ;;  %p2710_p5 = scmp.lt.u32.totalorder %s2702_s5, %s3566_s21 }
 0x28d   : > { %p2704_p3 = pnand %p2703_p0, %p3673_p9 }
 0x28e   : > { %p2709_p8 = por %p2708_p10, %p2707_p7 }
 0x28f   : > { %p2705_p6 = pneg %p2704_p3 }
 0x290   : > { %p2711_p11 = por %p2710_p5, %p2709_p8 }
 0x292   : > { %p2712_p12 = pnand %p2711_p11, %p2705_p6 }
 0x294   : > { %2715 = shalt.err (!%p2712_p12)
}
 0x295   : > { %s2801_s17 = smov 64   ;;  %s2802_s25 = smov 4   ;;  %v1546_v58 = vadd.f32 %v1545_v45, %v1544_v61  ;;  %v1582_v38 = vrot.slane %v1581_v39, 4  ;;  %vm1588_vm4 = vcmask 1040384  }
 0x296   : > { %2547 = dma.vmem_to_hbm [thread:$0]  (%p3673_p9), %s3561_s7, 1024, %s3566_s21, %s1592_s29, %s2801_s17, %s2801_s17, %s2802_s25  }
 0x297   : > { %v1547_v44 = vrot.slane %v1546_v58, 2  ;;  %v1583_v8 = vadd.f32 %v1582_v38, %v1581_v39  ;;  %s1794_s4 = sshll.u32 %s2792_s15, 1  ;;  %s1630_s23 = sshll.u32 %s2986_s24, 4  ;;  %s3601_s23 = int_to_ptr.vmem [resolvable:$true] %s1630_s23 }
 0x298   : > { %s1626_s8 = sadd.s32 %s2788_s14, %s1794_s4  ;;  %s1597_s14 = scalar_lea.sflag [#allocation8], %s2882_s28 }
 0x299   : > { %v1548_v4 = vadd.f32 %v1547_v44, %v1546_v58  ;;  %v1584_v28 = vrot.slane %v1583_v8, 2  ;;  %s1795_s9 = sshll.u32 %s1626_s8, 5  ;;  %s2716_s15 = scalar_lea.vmem %s3601_s23, 32 }
 0x29a   : > { %s3599_s29 = scalar_lea.hbm %s3648_s3, %s1795_s9  ;;  %p2717_p13 = scmp.ne.s32.totalorder %s3601_s23, %s2716_s15 }
 0x29b   : > { %v1549_v9 = vrot.slane %v1548_v4, 1  ;;  %v1585_v23 = vadd.f32 %v1584_v28, %v1583_v8  ;;  %s2803_s30 = smov [#allocation7]  }
 0x29c   : > { %p2718_p1 = pnand %p2717_p13, %p3673_p9  ;;  %s2720_s6 = sshll.u32 %s2803_s30, 4  ;;  %s2721_s6 = int_to_ptr.vmem [resolvable:$false] %s2720_s6 }
 0x29d   : > { %v1586_v25 = vrot.slane %v1585_v23, 1  ;;  %v1550_v11 = vadd.f32 %v1549_v9, %v1548_v4  ;;  %s2722_s10 = scalar_lea.vmem %s2721_s6, 64  ;;  %p2723_p4 = scmp.lt.s32.totalorder %s3601_s23, %s2721_s6 }
 0x29e   : > { %p2719_p2 = pneg %p2718_p1  ;;  %p2724_p0 = scmp.lt.s32.totalorder %s2722_s10, %s2716_s15 }
 0x29f   : > { %v1587_v18 = vadd.f32 %v1586_v25, %v1585_v23 }
 0x2a0   : > { %p2725_p3 = por %p2724_p0, %p2723_p4 }
 0x2a1   : > { %v1589_v3 = vsel %vm1588_vm4, %v1550_v11, %v1587_v18 }
 0x2a2   : > { %1590 = vst [vmem:[%s2986_s24] sm:$0x3] %v1589_v3  ;;  %p2726_p6 = pnand %p2725_p3, %p2719_p2 }
 0x2a4   : > { %2729 = shalt.err (!%p2726_p6)
}
 0x2a5   : > { %s2730_s28 = scalar_lea.hbm %s3599_s29, 32  ;;  %s2734_s5 = scalar_lea.hbm %s3648_s3, 128 }
 0x2a6   : > { %p2731_p7 = scmp.ne.s32.totalorder %s3599_s29, %s2730_s28  ;;  %p2735_p5 = scmp.lt.u32.totalorder %s3599_s29, %s3648_s3 }
 0x2a7   : > { %p2736_p11 = scmp.lt.u32.totalorder %s2734_s5, %s2730_s28  ;;  %p2738_p13 = scmp.lt.u32.totalorder %s2730_s28, %s3599_s29 }
 0x2a8   : > { %p2732_p10 = pnand %p2731_p7, %p3673_p9 }
 0x2a9   : > { %p2737_p12 = por %p2736_p11, %p2735_p5 }
 0x2aa   : > { %p2733_p8 = pneg %p2732_p10 }
 0x2ab   : > { %p2739_p1 = por %p2738_p13, %p2737_p12 }
 0x2ad   : > { %p2740_p2 = pnand %p2739_p1, %p2733_p8 }
 0x2af   : > { %2743 = shalt.err (!%p2740_p2)
}
 0x2b0   : > { %2548 = dma.vmem_to_hbm [thread:$0]  (%p3673_p9), %s3601_s23, 32, %s3599_s29, %s1597_s14  }
 0x2b1 PF: > { %p2561_p4 = scmp.ge.s32.totalorder %s2796_s16, 1  ;;  %s1642_s18 = sand.u32 1, %s2780_s12  }
 0x2b2   : > { %p3674_p0 = scmp.ne.s32.totalorder %s3658_s22, 0  ;;  %s1643_s20 = scalar_lea.sflag [#allocation6], %s1642_s18 }
 0x2b4   : > { %p2552_p3 = pnand %p2561_p4, %p3674_p0 }
 0x2b6   : > { %2771 = dma.done.wait (!%p2552_p3), %s1643_s20, 1024  }
 0x2b7   : > { %2773 = vsyncadd (!%p2552_p3), %s1643_s20, 4294966272  ;;  %s1652_s26 = scalar_lea.sflag [#allocation8], %s1642_s18 }
 0x2b8   : > { %2775 = dma.done.wait (!%p2552_p3), %s1652_s26, 32  }
 0x2b9   : > { %2777 = vsyncadd (!%p2552_p3), %s1652_s26, 4294967264  ;;  %s20_s16 = sadd.s32 1, %s2796_s16   ;;  %s3675_s27 = sld [smem:[#allocation23_spill]] }
 0x2ba   : > { %p17_p6 = scmp.ge.s32.totalorder %s20_s16, 5   ;;  %s3676_s14 = sld [smem:[#allocation21_spill]] }
 0x2bb   : > { %s3677_s15 = sld [smem:[#allocation22_spill]]  ;;  %s3678_s12 = smov %s2784_s13 }
 0x2bc   :  { %19 = sbr.rel (!%p17_p6) target bundleno = 8 (0x8), region = 99 }
 0x2bf   : > { %s3679_s13 = smov %s3675_s27 }
 0x2c3   :  { %1657 = vsyncpa [#allocation6], 1 }
 0x2c4   :  { %1659 = vsyncpa [#allocation6 + $0x1], 1 }
 0x2c5   :  { %1660 = vsyncpa [#allocation8], 1 }
 0x2c6   :  { %1662 = vsyncpa [#allocation8 + $0x1], 1 }
 0x2c7   :  { %1663 = vsyncmov [#allocation4] }
 0x2ca   :  { %s1664_s22 = vpop.sfrf %1663 }
 0x2cb   :  { %p1798_p9 = scmp.ne.s32.totalorder %s1664_s22, 0 }
 0x2cd   :  { %1668 = shalt.err (%p1798_p9)  }
 0x2ce   :  { %1670 = vsyncmov [#allocation4 + $0x1] }
 0x2d1   :  { %s1671_s17 = vpop.sfrf %1670 }
 0x2d2   :  { %p1799_p7 = scmp.ne.s32.totalorder %s1671_s17, 0 }
 0x2d4   :  { %1675 = shalt.err (%p1799_p7)  }
 0x2d5   :  { %1677 = vsyncmov [#allocation4 + $0x2] }
 0x2d8   :  { %s1678_s25 = vpop.sfrf %1677 }
 0x2d9   :  { %p1800_p10 = scmp.ne.s32.totalorder %s1678_s25, 0 }
 0x2db   :  { %1682 = shalt.err (%p1800_p10)  }

</bundles_post_ra>
